<compile_context>
chip_gen: v5e
topology: v5e:2x2
jax: 0.10.0
libtpu: 0.0.40
codegen_flags: <defaults>
</compile_context>

<pallas_src>
import functools

import jax
import jax.numpy as jnp
from jax import lax
from jax.experimental import pallas as pl
from jax.experimental.pallas import tpu as pltpu

BN_EPS = 1e-5
CPACK = 16          # bf16 sublane tile height: channel dims padded to this for alignment


# ----------------------------- fused Pallas kernel -----------------------------

def _fused_kernel(x_ref, w1_ref, g1_ref, be1_ref,
                  w2_ref, g2_ref, be2_ref,
                  w3_ref, b3_ref, mask_ref,
                  o_ref, y1_ref,
                  *, wp, mp, pad, cpmid, n_valid):
    """All activations are (channels, flattened padded spatial) with spatial in lanes.

    x_ref:    (CPin,  mp + 2*pad) bf16   padded input (zero channel rows + zero guards)
    w1_ref:   (CPmid, 9*CPin)     bf16   stacked 3x3 taps, column = tap*CPin + ci
    w2_ref:   (Cout,  9*CPmid)    bf16
    w3_ref:   (Cout,  Cout)       bf16   1x1 projection
    g*/be*:   (C, 1) f32                 BN gamma / beta (padded rows are 0)
    b3_ref:   (Cout, 1) f32              1x1 conv bias
    mask_ref: (1, mp) bf16               1.0 at real-pixel lanes, 0.0 at ring / dead tail
    o_ref:    (Cout, mp) f32             lane-dense output (interior sliced outside)
    y1_ref:   (CPmid, mp + 2*pad) bf16   persistent scratch for stage-1 activations
    """
    offs = tuple(dy * wp + dx for dy in (-1, 0, 1) for dx in (-1, 0, 1))
    mask = mask_ref[...].astype(jnp.float32)          # (1, mp)
    inv_n = 1.0 / n_valid

    def conv3x3(src_ref, w_ref):
        # Stack the 9 lane-shifted windows along sublanes -> ONE MXU matmul (K = 9*Cp).
        # Every piece is a whole number of bf16 sublane tiles, so the concat is aligned.
        wins = jnp.concatenate(
            [src_ref[:, pad + off: pad + off + mp] for off in offs], axis=0)
        return jnp.dot(w_ref[...], wins, preferred_element_type=jnp.float32)  # (Co, mp)

    def bn_relu(y, g_ref, be_ref):
        # Masked one-pass batch stats (biased variance over N,H,W) in f32.
        # NOTE: E[x^2] - mean^2 is less stable than the centered form when |mean| >> std;
        # fine at this scale / tolerance.
        ym = y * mask
        mean = jnp.sum(ym, axis=1, keepdims=True) * inv_n
        var = jnp.sum(ym * ym, axis=1, keepdims=True) * inv_n - mean * mean
        # BN affine folded into two per-channel scalars (rsqrt stays a tiny EUP op).
        s = g_ref[...] * lax.rsqrt(var + BN_EPS)       # (Co, 1)
        t = be_ref[...] - mean * s                     # (Co, 1)
        # trailing *mask zeroes the padding ring + dead tail -> doubles as stage-2 padding.
        return jnp.maximum(y * s + t, 0.0) * mask

    # ---- stage 1: conv3x3 + BN + ReLU (conv bias absorbed by training-mode BN) ----
    a1 = bn_relu(conv3x3(x_ref, w1_ref), g1_ref, be1_ref)

    # Zero ONLY the guard slabs actually read by the taps (one lane-aligned 128-col block
    # on each side); the interior is fully overwritten by the a1 store below.
    y1_ref[:, :pad] = jnp.zeros((cpmid, pad), y1_ref.dtype)
    y1_ref[:, pad + mp:] = jnp.zeros((cpmid, pad), y1_ref.dtype)
    y1_ref[:, pl.ds(pad, mp)] = a1.astype(y1_ref.dtype)

    # ---- stage 2: conv3x3 + BN + ReLU ----
    a2 = bn_relu(conv3x3(y1_ref, w2_ref), g2_ref, be2_ref)

    # ---- stage 3: 1x1 projection (+bias), lane-dense f32 store ----
    o_ref[...] = (jnp.dot(w3_ref[...], a2.astype(jnp.bfloat16),
                          preferred_element_type=jnp.float32) + b3_ref[...])


# ----------------------------- wrapper -----------------------------

def double_cna3x3_forward(params, x_nchw):
    N, Cin, H, W = x_nchw.shape
    Cmid = params["w1"].shape[0]
    Cout = params["w2"].shape[0]
    Hp, Wp = H + 2, W + 2
    Mreal = N * Hp * Wp
    MP = 128 * pl.cdiv(Mreal, 128)            # lane-dense internal / output width
    PAD = 128 * pl.cdiv(Wp + 1, 128)          # guard >= max tap shift, lane-aligned
    CPin = CPACK * pl.cdiv(Cin, CPACK)
    CPmid = CPACK * pl.cdiv(Cmid, CPACK)

    # NCHW -> (CPin, MP + 2*PAD): spatial zero ring, zero channel-pad rows, zero guards
    # and zero dead-tail columns.
    xp = jnp.pad(x_nchw, ((0, 0), (0, 0), (1, 1), (1, 1)))
    xt = jnp.transpose(xp, (1, 0, 2, 3)).reshape(Cin, Mreal)
    xt = jnp.pad(xt, ((0, CPin - Cin), (PAD, PAD + MP - Mreal))).astype(jnp.bfloat16)

    # 1.0 at real-pixel lanes of the flattened padded spatial axis (bf16 is exact for 0/1).
    mask = (jnp.zeros((N, Hp, Wp), jnp.float32)
            .at[:, 1:H + 1, 1:W + 1].set(1.0)
            .reshape(1, Mreal))
    mask = jnp.pad(mask, ((0, 0), (0, MP - Mreal))).astype(jnp.bfloat16)

    def stacked_taps(w_, co_pad, ci_pad):
        # (Co, Ci, 3, 3) -> (co_pad, 9*ci_pad) bf16, column index = (ky*3+kx)*ci_pad + ci.
        co, ci = w_.shape[0], w_.shape[1]
        wt = jnp.transpose(w_, (0, 2, 3, 1))                       # (co, ky, kx, ci)
        wt = jnp.pad(wt, ((0, co_pad - co), (0, 0), (0, 0), (0, ci_pad - ci)))
        return wt.reshape(co_pad, 9 * ci_pad).astype(jnp.bfloat16)

    def colpad(v, n):
        v = v.astype(jnp.float32).reshape(-1, 1)
        return jnp.pad(v, ((0, n - v.shape[0]), (0, 0)))

    kernel = functools.partial(_fused_kernel, wp=Wp, mp=MP, pad=PAD,
                               cpmid=CPmid, n_valid=N * H * W)

    vmem = pl.BlockSpec(memory_space=pltpu.MemorySpace.VMEM)
    out_t = pl.pallas_call(
        kernel,
        out_shape=jax.ShapeDtypeStruct((Cout, MP), jnp.float32),
        in_specs=[vmem] * 10,
        out_specs=vmem,
        scratch_shapes=[pltpu.VMEM((CPmid, MP + 2 * PAD), jnp.bfloat16)],
    )(xt,
      stacked_taps(params["w1"], CPmid, CPin),
      colpad(params["g1"], CPmid), colpad(params["beta1"], CPmid),
      stacked_taps(params["w2"], Cout, CPmid),
      colpad(params["g2"], Cout), colpad(params["beta2"], Cout),
      params["w3"][:, :, 0, 0].astype(jnp.bfloat16), colpad(params["b3"], Cout),
      mask)

    # (Cout, MP) -> NCHW (valid interior only; masked/ring/tail columns are discarded).
    out = out_t[:, :Mreal].reshape(Cout, N, Hp, Wp)[:, :, 1:H + 1, 1:W + 1]
    return jnp.transpose(out, (1, 0, 2, 3))


# ----------------------------- params & reference -----------------------------

def init_params(key, in_ch, out_ch, mid_ch=None):
    if mid_ch is None:
        mid_ch = out_ch
    ks = jax.random.split(key, 10)

    def conv_init(kw_, kb_, co, ci, kh, kwd):
        fan_in = ci * kh * kwd
        bound = 1.0 / jnp.sqrt(jnp.float32(fan_in))
        w = jax.random.uniform(kw_, (co, ci, kh, kwd), jnp.float32, -bound, bound)
        b = jax.random.uniform(kb_, (co,), jnp.float32, -bound, bound)
        return w, b

    w1, b1 = conv_init(ks[0], ks[1], mid_ch, in_ch, 3, 3)
    w2, b2 = conv_init(ks[2], ks[3], out_ch, mid_ch, 3, 3)
    w3, b3 = conv_init(ks[4], ks[5], out_ch, out_ch, 1, 1)
    return dict(
        w1=w1, b1=b1,
        g1=jax.random.uniform(ks[6], (mid_ch,), jnp.float32, 0.5, 1.5),
        beta1=0.1 * jax.random.normal(ks[7], (mid_ch,), jnp.float32),
        w2=w2, b2=b2,
        g2=jax.random.uniform(ks[8], (out_ch,), jnp.float32, 0.5, 1.5),
        beta2=0.1 * jax.random.normal(ks[9], (out_ch,), jnp.float32),
        w3=w3, b3=b3,
    )


def reference_forward(params, x_nchw):
    """Pure-JAX f32 reference matching the PyTorch training-mode forward (with biases)."""
    def conv(x, w, b, same):
        y = lax.conv_general_dilated(
            x, w, (1, 1), "SAME" if same else "VALID",
            dimension_numbers=("NCHW", "OIHW", "NCHW"))
        return y + b[None, :, None, None]

    def bn_relu(y, g, beta):
        mean = jnp.mean(y, axis=(0, 2, 3), keepdims=True)
        var = jnp.mean(jnp.square(y - mean), axis=(0, 2, 3), keepdims=True)
        yh = (y - mean) / jnp.sqrt(var + BN_EPS)
        return jnp.maximum(yh * g[None, :, None, None] + beta[None, :, None, None], 0.0)

    y = bn_relu(conv(x_nchw, params["w1"], params["b1"], True), params["g1"], params["beta1"])
    y = bn_relu(conv(y, params["w2"], params["b2"], True), params["g2"], params["beta2"])
    return conv(y, params["w3"], params["b3"], False)


# ----------------------------- main -----------------------------

if __name__ == "__main__":
    key = jax.random.PRNGKey(0)
    k_x, k_p = jax.random.split(key)

    N, in_ch, out_ch, H, W = 2, 4, 8, 16, 16
    x = jax.random.normal(k_x, (N, in_ch, H, W), jnp.float32)
    params = init_params(k_p, in_ch, out_ch)

    fwd = jax.jit(double_cna3x3_forward)
    out = jax.block_until_ready(fwd(params, x))
    ref = jax.block_until_ready(reference_forward(params, x))

    assert out.shape == (N, out_ch, H, W), out.shape
    # bf16 matmul operands (f32 accumulation / BN stats) -> loosened tolerance vs f32 ref.
    assert jnp.allclose(out, ref, rtol=5e-2, atol=5e-2), float(jnp.max(jnp.abs(out - ref)))
    print("KERNEL_OK")
</pallas_src>

<mosaic_0001>
module attributes {stable_mosaic.version = 11 : i64} {
  func.func @_fused_kernel(%arg0: memref<16x1024xbf16, #tpu.memory_space<vmem>>, %arg1: memref<16x144xbf16, #tpu.memory_space<vmem>>, %arg2: memref<16x1xf32, #tpu.memory_space<vmem>>, %arg3: memref<16x1xf32, #tpu.memory_space<vmem>>, %arg4: memref<8x144xbf16, #tpu.memory_space<vmem>>, %arg5: memref<8x1xf32, #tpu.memory_space<vmem>>, %arg6: memref<8x1xf32, #tpu.memory_space<vmem>>, %arg7: memref<8x8xbf16, #tpu.memory_space<vmem>>, %arg8: memref<8x1xf32, #tpu.memory_space<vmem>>, %arg9: memref<1x768xbf16, #tpu.memory_space<vmem>>, %arg10: memref<8x768xf32, #tpu.memory_space<vmem>>, %arg11: memref<16x1024xbf16, #tpu.memory_space<vmem>>) attributes {dimension_semantics = [], scalar_prefetch = 0 : i64, scratch_operands = 1 : i64, tpu.core_type = #tpu.core_type<tc>} {
    %c0 = arith.constant 0 : index
    %c0_0 = arith.constant 0 : index
    %0 = vector.load %arg9[%c0, %c0_0] : memref<1x768xbf16, #tpu.memory_space<vmem>>, vector<1x768xbf16>
    %1 = arith.extf %0 : vector<1x768xbf16> to vector<1x768xf32>
    %c0_1 = arith.constant 0 : index
    %c109 = arith.constant 109 : index
    %2 = vector.load %arg0[%c0_1, %c109] : memref<16x1024xbf16, #tpu.memory_space<vmem>>, vector<16x768xbf16>
    %c0_2 = arith.constant 0 : index
    %c110 = arith.constant 110 : index
    %3 = vector.load %arg0[%c0_2, %c110] : memref<16x1024xbf16, #tpu.memory_space<vmem>>, vector<16x768xbf16>
    %c0_3 = arith.constant 0 : index
    %c111 = arith.constant 111 : index
    %4 = vector.load %arg0[%c0_3, %c111] : memref<16x1024xbf16, #tpu.memory_space<vmem>>, vector<16x768xbf16>
    %c0_4 = arith.constant 0 : index
    %c127 = arith.constant 127 : index
    %5 = vector.load %arg0[%c0_4, %c127] : memref<16x1024xbf16, #tpu.memory_space<vmem>>, vector<16x768xbf16>
    %c0_5 = arith.constant 0 : index
    %c128 = arith.constant 128 : index
    %6 = vector.load %arg0[%c0_5, %c128] : memref<16x1024xbf16, #tpu.memory_space<vmem>>, vector<16x768xbf16>
    %c0_6 = arith.constant 0 : index
    %c129 = arith.constant 129 : index
    %7 = vector.load %arg0[%c0_6, %c129] : memref<16x1024xbf16, #tpu.memory_space<vmem>>, vector<16x768xbf16>
    %c0_7 = arith.constant 0 : index
    %c145 = arith.constant 145 : index
    %8 = vector.load %arg0[%c0_7, %c145] : memref<16x1024xbf16, #tpu.memory_space<vmem>>, vector<16x768xbf16>
    %c0_8 = arith.constant 0 : index
    %c146 = arith.constant 146 : index
    %9 = vector.load %arg0[%c0_8, %c146] : memref<16x1024xbf16, #tpu.memory_space<vmem>>, vector<16x768xbf16>
    %c0_9 = arith.constant 0 : index
    %c147 = arith.constant 147 : index
    %10 = vector.load %arg0[%c0_9, %c147] : memref<16x1024xbf16, #tpu.memory_space<vmem>>, vector<16x768xbf16>
    %11 = tpu.concatenate %2, %3, %4, %5, %6, %7, %8, %9, %10 in 0 : vector<16x768xbf16>, vector<16x768xbf16>, vector<16x768xbf16>, vector<16x768xbf16>, vector<16x768xbf16>, vector<16x768xbf16>, vector<16x768xbf16>, vector<16x768xbf16>, vector<16x768xbf16> -> vector<144x768xbf16>
    %c0_10 = arith.constant 0 : index
    %c0_11 = arith.constant 0 : index
    %12 = vector.load %arg1[%c0_10, %c0_11] : memref<16x144xbf16, #tpu.memory_space<vmem>>, vector<16x144xbf16>
    %cst = arith.constant dense<0.000000e+00> : vector<16x768xf32>
    %13 = tpu.matmul %12, %11, %cst {dimension_numbers = #tpu.dot_dimension_numbers<[1], [0], [0], [1], [0, 0, 1, 1], [], []>} : vector<16x144xbf16>, vector<144x768xbf16>, vector<16x768xf32> -> vector<16x768xf32>
    %14 = vector.broadcast %1 : vector<1x768xf32> to vector<16x768xf32>
    %15 = arith.mulf %13, %14 : vector<16x768xf32>
    %cst_12 = arith.constant dense<0.000000e+00> : vector<16xf32>
    %16 = vector.multi_reduction <add>, %15, %cst_12 [1] : vector<16x768xf32> to vector<16xf32>
    %17 = vector.shape_cast %16 : vector<16xf32> to vector<16x1xf32>
    %cst_13 = arith.constant 0.001953125 : f32
    %18 = vector.broadcast %cst_13 : f32 to vector<16x1xf32>
    %19 = arith.mulf %17, %18 : vector<16x1xf32>
    %20 = arith.mulf %15, %15 : vector<16x768xf32>
    %cst_14 = arith.constant dense<0.000000e+00> : vector<16xf32>
    %21 = vector.multi_reduction <add>, %20, %cst_14 [1] : vector<16x768xf32> to vector<16xf32>
    %22 = vector.shape_cast %21 : vector<16xf32> to vector<16x1xf32>
    %cst_15 = arith.constant 0.001953125 : f32
    %23 = vector.broadcast %cst_15 : f32 to vector<16x1xf32>
    %24 = arith.mulf %22, %23 : vector<16x1xf32>
    %25 = arith.mulf %19, %19 : vector<16x1xf32>
    %26 = arith.subf %24, %25 : vector<16x1xf32>
    %c0_16 = arith.constant 0 : index
    %c0_17 = arith.constant 0 : index
    %27 = vector.load %arg2[%c0_16, %c0_17] : memref<16x1xf32, #tpu.memory_space<vmem>>, vector<16x1xf32>
    %cst_18 = arith.constant 9.99999974E-6 : f32
    %28 = vector.broadcast %cst_18 : f32 to vector<16x1xf32>
    %29 = arith.addf %26, %28 : vector<16x1xf32>
    %30 = math.rsqrt %29 : vector<16x1xf32>
    %31 = arith.mulf %27, %30 : vector<16x1xf32>
    %c0_19 = arith.constant 0 : index
    %c0_20 = arith.constant 0 : index
    %32 = vector.load %arg3[%c0_19, %c0_20] : memref<16x1xf32, #tpu.memory_space<vmem>>, vector<16x1xf32>
    %33 = arith.mulf %19, %31 : vector<16x1xf32>
    %34 = arith.subf %32, %33 : vector<16x1xf32>
    %35 = vector.broadcast %31 : vector<16x1xf32> to vector<16x768xf32>
    %36 = arith.mulf %13, %35 : vector<16x768xf32>
    %37 = vector.broadcast %34 : vector<16x1xf32> to vector<16x768xf32>
    %38 = arith.addf %36, %37 : vector<16x768xf32>
    %cst_21 = arith.constant 0.000000e+00 : f32
    %39 = vector.broadcast %cst_21 : f32 to vector<16x768xf32>
    %40 = arith.maximumf %38, %39 : vector<16x768xf32>
    %41 = vector.broadcast %1 : vector<1x768xf32> to vector<16x768xf32>
    %42 = arith.mulf %40, %41 : vector<16x768xf32>
    %cst_22 = arith.constant 0.000000e+00 : bf16
    %43 = vector.broadcast %cst_22 : bf16 to vector<16x128xbf16>
    %c0_23 = arith.constant 0 : index
    %c0_24 = arith.constant 0 : index
    %44 = vector.load %arg11[%c0_23, %c0_24] : memref<16x1024xbf16, #tpu.memory_space<vmem>>, vector<16x128xbf16>
    tpu.vector_store %arg11[%c0_23, %c0_24], %43 {strides = array<i32>} : memref<16x1024xbf16, #tpu.memory_space<vmem>>, vector<16x128xbf16>,
    %cst_25 = arith.constant 0.000000e+00 : bf16
    %45 = vector.broadcast %cst_25 : bf16 to vector<16x128xbf16>
    %c0_26 = arith.constant 0 : index
    %c896 = arith.constant 896 : index
    %46 = vector.load %arg11[%c0_26, %c896] : memref<16x1024xbf16, #tpu.memory_space<vmem>>, vector<16x128xbf16>
    tpu.vector_store %arg11[%c0_26, %c896], %45 {strides = array<i32>} : memref<16x1024xbf16, #tpu.memory_space<vmem>>, vector<16x128xbf16>,
    %47 = arith.truncf %42 : vector<16x768xf32> to vector<16x768xbf16>
    %c0_27 = arith.constant 0 : index
    %c128_28 = arith.constant 128 : index
    %48 = vector.load %arg11[%c0_27, %c128_28] : memref<16x1024xbf16, #tpu.memory_space<vmem>>, vector<16x768xbf16>
    tpu.vector_store %arg11[%c0_27, %c128_28], %47 {strides = array<i32>} : memref<16x1024xbf16, #tpu.memory_space<vmem>>, vector<16x768xbf16>,
    %c0_29 = arith.constant 0 : index
    %c109_30 = arith.constant 109 : index
    %49 = vector.load %arg11[%c0_29, %c109_30] : memref<16x1024xbf16, #tpu.memory_space<vmem>>, vector<16x768xbf16>
    %c0_31 = arith.constant 0 : index
    %c110_32 = arith.constant 110 : index
    %50 = vector.load %arg11[%c0_31, %c110_32] : memref<16x1024xbf16, #tpu.memory_space<vmem>>, vector<16x768xbf16>
    %c0_33 = arith.constant 0 : index
    %c111_34 = arith.constant 111 : index
    %51 = vector.load %arg11[%c0_33, %c111_34] : memref<16x1024xbf16, #tpu.memory_space<vmem>>, vector<16x768xbf16>
    %c0_35 = arith.constant 0 : index
    %c127_36 = arith.constant 127 : index
    %52 = vector.load %arg11[%c0_35, %c127_36] : memref<16x1024xbf16, #tpu.memory_space<vmem>>, vector<16x768xbf16>
    %c0_37 = arith.constant 0 : index
    %c128_38 = arith.constant 128 : index
    %53 = vector.load %arg11[%c0_37, %c128_38] : memref<16x1024xbf16, #tpu.memory_space<vmem>>, vector<16x768xbf16>
    %c0_39 = arith.constant 0 : index
    %c129_40 = arith.constant 129 : index
    %54 = vector.load %arg11[%c0_39, %c129_40] : memref<16x1024xbf16, #tpu.memory_space<vmem>>, vector<16x768xbf16>
    %c0_41 = arith.constant 0 : index
    %c145_42 = arith.constant 145 : index
    %55 = vector.load %arg11[%c0_41, %c145_42] : memref<16x1024xbf16, #tpu.memory_space<vmem>>, vector<16x768xbf16>
    %c0_43 = arith.constant 0 : index
    %c146_44 = arith.constant 146 : index
    %56 = vector.load %arg11[%c0_43, %c146_44] : memref<16x1024xbf16, #tpu.memory_space<vmem>>, vector<16x768xbf16>
    %c0_45 = arith.constant 0 : index
    %c147_46 = arith.constant 147 : index
    %57 = vector.load %arg11[%c0_45, %c147_46] : memref<16x1024xbf16, #tpu.memory_space<vmem>>, vector<16x768xbf16>
    %58 = tpu.concatenate %49, %50, %51, %52, %53, %54, %55, %56, %57 in 0 : vector<16x768xbf16>, vector<16x768xbf16>, vector<16x768xbf16>, vector<16x768xbf16>, vector<16x768xbf16>, vector<16x768xbf16>, vector<16x768xbf16>, vector<16x768xbf16>, vector<16x768xbf16> -> vector<144x768xbf16>
    %c0_47 = arith.constant 0 : index
    %c0_48 = arith.constant 0 : index
    %59 = vector.load %arg4[%c0_47, %c0_48] : memref<8x144xbf16, #tpu.memory_space<vmem>>, vector<8x144xbf16>
    %cst_49 = arith.constant dense<0.000000e+00> : vector<8x768xf32>
    %60 = tpu.matmul %59, %58, %cst_49 {dimension_numbers = #tpu.dot_dimension_numbers<[1], [0], [0], [1], [0, 0, 1, 1], [], []>} : vector<8x144xbf16>, vector<144x768xbf16>, vector<8x768xf32> -> vector<8x768xf32>
    %61 = vector.broadcast %1 : vector<1x768xf32> to vector<8x768xf32>
    %62 = arith.mulf %60, %61 : vector<8x768xf32>
    %cst_50 = arith.constant dense<0.000000e+00> : vector<8xf32>
    %63 = vector.multi_reduction <add>, %62, %cst_50 [1] : vector<8x768xf32> to vector<8xf32>
    %64 = vector.shape_cast %63 : vector<8xf32> to vector<8x1xf32>
    %cst_51 = arith.constant 0.001953125 : f32
    %65 = vector.broadcast %cst_51 : f32 to vector<8x1xf32>
    %66 = arith.mulf %64, %65 : vector<8x1xf32>
    %67 = arith.mulf %62, %62 : vector<8x768xf32>
    %cst_52 = arith.constant dense<0.000000e+00> : vector<8xf32>
    %68 = vector.multi_reduction <add>, %67, %cst_52 [1] : vector<8x768xf32> to vector<8xf32>
    %69 = vector.shape_cast %68 : vector<8xf32> to vector<8x1xf32>
    %cst_53 = arith.constant 0.001953125 : f32
    %70 = vector.broadcast %cst_53 : f32 to vector<8x1xf32>
    %71 = arith.mulf %69, %70 : vector<8x1xf32>
    %72 = arith.mulf %66, %66 : vector<8x1xf32>
    %73 = arith.subf %71, %72 : vector<8x1xf32>
    %c0_54 = arith.constant 0 : index
    %c0_55 = arith.constant 0 : index
    %74 = vector.load %arg5[%c0_54, %c0_55] : memref<8x1xf32, #tpu.memory_space<vmem>>, vector<8x1xf32>
    %cst_56 = arith.constant 9.99999974E-6 : f32
    %75 = vector.broadcast %cst_56 : f32 to vector<8x1xf32>
    %76 = arith.addf %73, %75 : vector<8x1xf32>
    %77 = math.rsqrt %76 : vector<8x1xf32>
    %78 = arith.mulf %74, %77 : vector<8x1xf32>
    %c0_57 = arith.constant 0 : index
    %c0_58 = arith.constant 0 : index
    %79 = vector.load %arg6[%c0_57, %c0_58] : memref<8x1xf32, #tpu.memory_space<vmem>>, vector<8x1xf32>
    %80 = arith.mulf %66, %78 : vector<8x1xf32>
    %81 = arith.subf %79, %80 : vector<8x1xf32>
    %82 = vector.broadcast %78 : vector<8x1xf32> to vector<8x768xf32>
    %83 = arith.mulf %60, %82 : vector<8x768xf32>
    %84 = vector.broadcast %81 : vector<8x1xf32> to vector<8x768xf32>
    %85 = arith.addf %83, %84 : vector<8x768xf32>
    %cst_59 = arith.constant 0.000000e+00 : f32
    %86 = vector.broadcast %cst_59 : f32 to vector<8x768xf32>
    %87 = arith.maximumf %85, %86 : vector<8x768xf32>
    %88 = vector.broadcast %1 : vector<1x768xf32> to vector<8x768xf32>
    %89 = arith.mulf %87, %88 : vector<8x768xf32>
    %c0_60 = arith.constant 0 : index
    %c0_61 = arith.constant 0 : index
    %90 = vector.load %arg7[%c0_60, %c0_61] : memref<8x8xbf16, #tpu.memory_space<vmem>>, vector<8x8xbf16>
    %91 = arith.truncf %89 : vector<8x768xf32> to vector<8x768xbf16>
    %cst_62 = arith.constant dense<0.000000e+00> : vector<8x768xf32>
    %92 = tpu.matmul %90, %91, %cst_62 {dimension_numbers = #tpu.dot_dimension_numbers<[1], [0], [0], [1], [0, 0, 1, 1], [], []>} : vector<8x8xbf16>, vector<8x768xbf16>, vector<8x768xf32> -> vector<8x768xf32>
    %c0_63 = arith.constant 0 : index
    %c0_64 = arith.constant 0 : index
    %93 = vector.load %arg8[%c0_63, %c0_64] : memref<8x1xf32, #tpu.memory_space<vmem>>, vector<8x1xf32>
    %94 = vector.broadcast %93 : vector<8x1xf32> to vector<8x768xf32>
    %95 = arith.addf %92, %94 : vector<8x768xf32>
    %c0_65 = arith.constant 0 : index
    %c0_66 = arith.constant 0 : index
    %96 = vector.load %arg10[%c0_65, %c0_66] : memref<8x768xf32, #tpu.memory_space<vmem>>, vector<8x768xf32>
    tpu.vector_store %arg10[%c0_65, %c0_66], %95 {strides = array<i32>} : memref<8x768xf32, #tpu.memory_space<vmem>>, vector<8x768xf32>,
    return
  }
}

</mosaic_0001>

<bundles_post_ra>
// kernel: double_cna3x3_forward.1
= control target key start
LH: loop header
LB: loop body
LE: loop exit
PB: predicated region body
PF: predicated region fallthrough
CT: control target
= control target key end

     0   :  { %s2034_s21 = smov 91   ;;  %s2035_s22 = smov 92   ;;  %vm280_vm0 = vcmask 744448   ;;  %vm259_vm1 = vcmask 752640   ;;  %vm238_vm2 = vcmask 883712   ;;  %vm189_vm3 = vcmask 891904   ;;  %s3309_s0 = inlined_call_operand.vmem [shape: bf16[16,1024], index: 0, kind: input, shape index: {}]   ;;  %s3310_s1 = inlined_call_operand.vmem [shape: bf16[16,144], index: 1, kind: input, shape index: {}]   ;;  %s3311_s9 = inlined_call_operand.vmem [shape: bf16[1,768], index: 9, kind: input, shape index: {}]   ;;  %s3312_s2 = inlined_call_operand.vmem [shape: f32[16,1], index: 2, kind: input, shape index: {}]   ;;  %s3313_s3 = inlined_call_operand.vmem [shape: f32[16,1], index: 3, kind: input, shape index: {}]   ;;  %s3314_s4 = inlined_call_operand.vmem [shape: bf16[8,144], index: 4, kind: input, shape index: {}]   ;;  %s3315_s5 = inlined_call_operand.vmem [shape: f32[8,1], index: 5, kind: input, shape index: {}]   ;;  %s3316_s6 = inlined_call_operand.vmem [shape: f32[8,1], index: 6, kind: input, shape index: {}]   ;;  %s3317_s8 = inlined_call_operand.vmem [shape: f32[8,1], index: 8, kind: input, shape index: {}]   ;;  %s3318_s7 = inlined_call_operand.vmem [shape: bf16[8,8], index: 7, kind: input, shape index: {}]   ;;  %s3319_s10 = inlined_call_operand.vmem [shape: f32[8,768], index: 10, kind: output, shape index: {}]  }
   0x1   :  { %v1849_v0 = vld [vmem:[%s3309_s0 + $0xc] sm:$0xf]  ;;  %v1841_v2 = vld [vmem:[%s3309_s0 + $0x4] sm:$0xf]  ;;  %v1987_v6 = vld [vmem:[%s3309_s0 + $0x10] sm:$0xf] }
   0x2   :  { %v1990_v1 = vld [vmem:[%s3309_s0 + $0x28] sm:$0xf0]  ;;  %v1989_v4 = vld [vmem:[%s3309_s0 + $0x20] sm:$0xf0]  ;;  %v1851_v7 = vld [vmem:[%s3309_s0 + $0x2c] sm:$0xf0] }
   0x3   :  { %v2108_v3 = vor.u32 %v1990_v1, %v1849_v0  ;;  %v1842_v5 = vor.u32 %v1989_v4, %v1841_v2  ;;  %v1986_v8 = vld [vmem:[%s3309_s0 + $0x8] sm:$0xf]  ;;  %v2129_v10 = vor.u32 %v1987_v6, %v1851_v7  ;;  %s2036_s11 = smov 108   ;;  %v1825_v12 = vld [vmem:[%s3309_s0 + $0xc] sm:$0xf]  ;;  %s2037_s26 = smov 109  }
   0x4   :  { %v1843_v9 = vld [vmem:[%s3309_s0 + $0x24] sm:$0xf0]  ;;  %v1984_v15 = vld [vmem:[%s3309_s0 + $0x28] sm:$0xf0]  ;;  %v1817_v16 = vld [vmem:[%s3309_s0 + $0x4] sm:$0xf] }
   0x5   :  { %270 = vrot.lane.b32.xlu1 %v2108_v3, %s2034_s21  ;;  %245 = vrot.lane.b32.xlu2 %v1842_v5, %s2035_s22  ;;  %v1846_v11 = vor.u32 %v1986_v8, %v1843_v9  ;;  %v1980_v13 = vld [vmem:[%s3309_s0 + $0x8] sm:$0xf]  ;;  %v1983_v17 = vld [vmem:[%s3309_s0 + $0x20] sm:$0xf0]  ;;  %v1826_v19 = vor.u32 %v1984_v15, %v1825_v12  ;;  %s2038_s12 = smov 90   ;;  %s2039_s28 = smov 110  }
   0x6   :  { %266 = vrot.lane.b32.xlu0 %v1842_v5, %s2034_s21  ;;  %v1819_v14 = vld [vmem:[%s3309_s0 + $0x24] sm:$0xf0]  ;;  %v1818_v20 = vor.u32 %v1983_v17, %v1817_v16  ;;  %v1981_v21 = vld [vmem:[%s3309_s0 + $0x10] sm:$0xf]  ;;  %v1973_v25 = vld [vmem:[%s3309_s0 + $0x4] sm:$0xf] }
   0x7   :  { %v1822_v18 = vor.u32 %v1980_v13, %v1819_v14  ;;  %v1827_v22 = vld [vmem:[%s3309_s0 + $0x2c] sm:$0xf0]  ;;  %v1797_v24 = vld [vmem:[%s3309_s0 + $0x8] sm:$0xf]  ;;  %v1791_v26 = vld [vmem:[%s3309_s0 + $0x20] sm:$0xf0] }
   0x8   :  { %v1830_v23 = vor.u32 %v1981_v21, %v1827_v22  ;;  %v1977_v27 = vld [vmem:[%s3309_s0 + $0x24] sm:$0xf0]  ;;  %v1789_v28 = vld [vmem:[%s3309_s0] sm:$0xf]  ;;  %v2193_v30 = vor.u32 %v1973_v25, %v1791_v26  ;;  %v1805_v33 = vld [vmem:[%s3309_s0 + $0x10] sm:$0xf] }
   0x9   :  { %v1976_v29 = vld [vmem:[%s3309_s0 + $0x1c] sm:$0xf0]  ;;  %v2195_v31 = vor.u32 %v1977_v27, %v1797_v24  ;;  %v1978_v34 = vld [vmem:[%s3309_s0 + $0x2c] sm:$0xf0]  ;;  %v1974_v35 = vld [vmem:[%s3309_s0 + $0xc] sm:$0xf] }
   0xa   :  { %v2197_v32 = vor.u32 %v1976_v29, %v1789_v28  ;;  %v1799_v36 = vld [vmem:[%s3309_s0 + $0x28] sm:$0xf0]  ;;  %v2217_v37 = vor.u32 %v1978_v34, %v1805_v33  ;;  %s2040_s19 = smov 126   ;;  %v1857_v39 = vld [vmem:[%s3309_s0 + $0x14] sm:$0xf]  ;;  %s2041_s27 = smov 127  }
   0xb   :  { %v2219_v38 = vor.u32 %v1974_v35, %v1799_v36  ;;  %v1991_v40 = vld [vmem:[%s3309_s0 + $0x30] sm:$0xf0]  ;;  %v1988_v42 = vld [vmem:[%s3309_s0 + $0x18] sm:$0xf]  ;;  %v1865_v46 = vld [vmem:[%s3309_s0 + $0x1c] sm:$0xf] }
   0xc   :  { %v2239_v41 = vor.u32 %v1991_v40, %v1857_v39  ;;  %v1859_v43 = vld [vmem:[%s3309_s0 + $0x34] sm:$0xf0]  ;;  %v1992_v47 = vld [vmem:[%s3309_s0 + $0x38] sm:$0xf0]  ;;  %v1833_v48 = vld [vmem:[%s3309_s0 + $0x14] sm:$0xf] }
   0xd   :  { %272 = vrot.lane.b32.xlu1 %v2129_v10, %s2034_s21  ;;  %247 = vrot.lane.b32.xlu2 %v1846_v11, %s2035_s22  ;;  %v1862_v44 = vor.u32 %v1988_v42, %v1859_v43  ;;  %v1985_v49 = vld [vmem:[%s3309_s0 + $0x30] sm:$0xf0]  ;;  %v2283_v51 = vor.u32 %v1992_v47, %v1865_v46  ;;  %v1982_v53 = vld [vmem:[%s3309_s0 + $0x18] sm:$0xf]  ;;  %vm301_vm4 = vcmask 736256   ;;  %vm146_vm5 = vcmask 900096  }
   0xe   :  { %268 = vrot.lane.b32.xlu0 %v1846_v11, %s2034_s21  ;;  %v1834_v52 = vor.u32 %v1985_v49, %v1833_v48  ;;  %v1835_v54 = vld [vmem:[%s3309_s0 + $0x34] sm:$0xf0]  ;;  %v1975_v60 = vld [vmem:[%s3309_s0 + $0x14] sm:$0xf]  ;;  %vm125_vm6 = vcmask 1031168   ;;  %vm104_vm7 = vcmask 1039360  }
   0xf   :  { %v1838_v56 = vor.u32 %v1982_v53, %v1835_v54  ;;  %v1813_v57 = vld [vmem:[%s3309_s0 + $0x18] sm:$0xf]  ;;  %v1807_v61 = vld [vmem:[%s3309_s0 + $0x30] sm:$0xf0]  ;;  %vm445_vm8 = vcmask 154624   ;;  %vm554_vm9 = vcmask 130048  }
  0x10   :  { %v1979_v58 = vld [vmem:[%s3309_s0 + $0x34] sm:$0xf0]  ;;  %v2318_v1 = vor.u32 %v1975_v60, %v1807_v61  ;;  %s2042_s0 = smov 19  }
  0x11   :  { %v2316_v0 = vor.u32 %v1979_v58, %v1813_v57 }
  0x15   :  { %251 = vrot.lane.b32.xlu1 %v2129_v10, %s2035_s22  ;;  %224 = vrot.lane.b32.xlu2 %v1842_v5, %s2036_s11 }
  0x16   :  { %249 = vrot.lane.b32.xlu0 %v2108_v3, %s2035_s22 }
  0x1d   :  { %228 = vrot.lane.b32.xlu1 %v2108_v3, %s2036_s11  ;;  %230 = vrot.lane.b32.xlu2 %v2129_v10, %s2036_s11 }
  0x1e   :  { %226 = vrot.lane.b32.xlu0 %v1846_v11, %s2036_s11 }
  0x25   :  { %179 = vrot.lane.b32.xlu1 %v1822_v18, %s2037_s26  ;;  %181 = vrot.lane.b32.xlu2 %v1826_v19, %s2037_s26 }
  0x26   :  { %177 = vrot.lane.b32.xlu0 %v1818_v20, %s2037_s26 }
  0x2d   :  { %287 = vrot.lane.b32.xlu1 %v1842_v5, %s2038_s12  ;;  %289 = vrot.lane.b32.xlu2 %v1846_v11, %s2038_s12 }
  0x2e   :  { %183 = vrot.lane.b32.xlu0 %v1830_v23, %s2037_s26 }
  0x35   :  { %134 = vrot.lane.b32.xlu1 %v2193_v30, %s2039_s28  ;;  %136 = vrot.lane.b32.xlu2 %v2195_v31, %s2039_s28 }
  0x36   :  { %132 = vrot.lane.b32.xlu0 %v2197_v32, %s2039_s28 }
  0x3d   :  { %140 = vrot.lane.b32.xlu1 %v2217_v37, %s2039_s28  ;;  %291 = vrot.lane.b32.xlu2 %v2108_v3, %s2038_s12 }
  0x3e   :  { %138 = vrot.lane.b32.xlu0 %v2219_v38, %s2039_s28 }
  0x45   :  { %113 = vrot.lane.b32.xlu1 %v2193_v30, %s2040_s19  ;;  %115 = vrot.lane.b32.xlu2 %v2195_v31, %s2040_s19 }
  0x46   :  { %111 = vrot.lane.b32.xlu0 %v2197_v32, %s2040_s19 }
  0x4d   :  { %119 = vrot.lane.b32.xlu1 %v2217_v37, %s2040_s19  ;;  %274 = vrot.lane.b32.xlu2 %v2239_v41, %s2034_s21 }
  0x4e   :  { %117 = vrot.lane.b32.xlu0 %v2219_v38, %s2040_s19 }
  0x55   :  { %92 = vrot.lane.b32.xlu1 %v2193_v30, %s2041_s27  ;;  %94 = vrot.lane.b32.xlu2 %v2195_v31, %s2041_s27 }
  0x56   :  { %90 = vrot.lane.b32.xlu0 %v2197_v32, %s2041_s27 }
  0x5d   :  { %98 = vrot.lane.b32.xlu1 %v2217_v37, %s2041_s27  ;;  %276 = vrot.lane.b32.xlu2 %v1862_v44, %s2034_s21 }
  0x5e   :  { %96 = vrot.lane.b32.xlu0 %v2219_v38, %s2041_s27 }
  0x5f   :  { %v2264_v45 = vpop.permute.xlu2 %245 }
  0x65   :  { %255 = vrot.lane.b32.xlu1 %v1862_v44, %s2035_s22  ;;  %232 = vrot.lane.b32.xlu2 %v2239_v41, %s2036_s11 }
  0x66   :  { %253 = vrot.lane.b32.xlu0 %v2239_v41, %s2035_s22 }
  0x67   :  { %v248_v50 = vpop.permute.xlu2 %247 }
  0x68   :  { %v260_v19 = vsel %vm259_vm1, %v2264_v45, %v248_v50 }
  0x6d   :  { %278 = vrot.lane.b32.xlu1 %v2283_v51, %s2034_s21  ;;  %185 = vrot.lane.b32.xlu2 %v1834_v52, %s2037_s26 }
  0x6e   :  { %234 = vrot.lane.b32.xlu0 %v1862_v44, %s2036_s11 }
  0x6f   :  { %v2295_v55 = vpop.permute.xlu2 %224 }
  0x75   :  { %187 = vrot.lane.b32.xlu1 %v1838_v56, %s2037_s26  ;;  %257 = vrot.lane.b32.xlu2 %v2283_v51, %s2035_s22 }
  0x76   :  { %293 = vrot.lane.b32.xlu0 %v2129_v10, %s2038_s12 }
  0x77   :  { %v271_v59 = vpop.permute.xlu1 %270  ;;  %v2314_v63 = vpop.permute.xlu2 %230 }
  0x78   :  { %v267_v62 = vpop.permute.xlu0 %266 }
  0x7d   :  { %144 = vrot.lane.b32.xlu1 %v2316_v0, %s2039_s28  ;;  %236 = vrot.lane.b32.xlu2 %v2283_v51, %s2036_s11 }
  0x7e   :  { %142 = vrot.lane.b32.xlu0 %v2318_v1, %s2039_s28 }
  0x7f   :  { %v2326_v2 = vpop.permute.xlu1 %272  ;;  %v182_v4 = vpop.permute.xlu2 %181 }
  0x80   :  { %v269_v3 = vpop.permute.xlu0 %268  ;;  %v283_v10 = vsel %vm280_vm0, %v271_v59, %v2326_v2 }
  0x81   :  { %v281_v5 = vsel %vm280_vm0, %v267_v62, %v269_v3  ;;  %v282_v6 = vsel %vm280_vm0, %v269_v3, %v271_v59 }
  0x85   :  { %419 = vrot.lane.b32.xlu1 %v281_v5, %s2042_s0  ;;  %421 = vrot.lane.b32.xlu2 %v282_v6, %s2042_s0 }
  0x86   :  { %417 = vrot.lane.b32.xlu0 %v267_v62, %s2042_s0 }
  0x87   :  { %v2333_v7 = vpop.permute.xlu1 %251  ;;  %v2335_v9 = vpop.permute.xlu2 %289 }
  0x88   :  { %v250_v8 = vpop.permute.xlu0 %249 }
  0x89   :  { %v261_v17 = vsel %vm259_vm1, %v248_v50, %v250_v8  ;;  %v262_v18 = vsel %vm259_vm1, %v250_v8, %v2333_v7 }
  0x8d   :  { %121 = vrot.lane.b32.xlu1 %v2318_v1, %s2040_s19  ;;  %123 = vrot.lane.b32.xlu2 %v2316_v0, %s2040_s19 }
  0x8e   :  { %423 = vrot.lane.b32.xlu0 %v283_v10, %s2042_s0 }
  0x8f   :  { %v229_v11 = vpop.permute.xlu1 %228  ;;  %v137_v13 = vpop.permute.xlu2 %136 }
  0x90   :  { %v227_v12 = vpop.permute.xlu0 %226  ;;  %v241_v27 = vsel %vm238_vm2, %v229_v11, %v2314_v63 }
  0x91   :  { %v240_v26 = vsel %vm238_vm2, %v227_v12, %v229_v11  ;;  %v239_v28 = vsel %vm238_vm2, %v2295_v55, %v227_v12 }
  0x95   :  { %297 = vrot.lane.b32.xlu1 %v1862_v44, %s2038_s12  ;;  %403 = vrot.lane.b32.xlu2 %v2264_v45, %s2042_s0 }
  0x96   :  { %295 = vrot.lane.b32.xlu0 %v2239_v41, %s2038_s12 }
  0x97   :  { %v180_v14 = vpop.permute.xlu1 %179  ;;  %v2349_v16 = vpop.permute.xlu2 %291 }
  0x98   :  { %v178_v15 = vpop.permute.xlu0 %177  ;;  %v191_v36 = vsel %vm189_vm3, %v180_v14, %v182_v4  ;;  %v303_v54 = vsel %vm301_vm4, %v2335_v9, %v2349_v16 }
  0x99   :  { %v190_v35 = vsel %vm189_vm3, %v178_v15, %v180_v14 }
  0x9d   :  { %407 = vrot.lane.b32.xlu1 %v261_v17, %s2042_s0  ;;  %409 = vrot.lane.b32.xlu2 %v262_v18, %s2042_s0 }
  0x9e   :  { %405 = vrot.lane.b32.xlu0 %v260_v19, %s2042_s0 }
  0x9f   :  { %v288_v20 = vpop.permute.xlu1 %287  ;;  %v116_v22 = vpop.permute.xlu2 %115 }
  0xa0   :  { %v2359_v21 = vpop.permute.xlu0 %183  ;;  %v302_v42 = vsel %vm301_vm4, %v288_v20, %v2335_v9 }
  0xa1   :  { %v192_v43 = vsel %vm189_vm3, %v182_v4, %v2359_v21 }
  0xa5   :  { %102 = vrot.lane.b32.xlu1 %v2316_v0, %s2041_s27  ;;  %389 = vrot.lane.b32.xlu2 %v2295_v55, %s2042_s0 }
  0xa6   :  { %100 = vrot.lane.b32.xlu0 %v2318_v1, %s2041_s27 }
  0xa7   :  { %v135_v23 = vpop.permute.xlu1 %134  ;;  %v2367_v24 = vpop.permute.xlu2 %274 }
  0xa8   :  { %v133_v25 = vpop.permute.xlu0 %132  ;;  %v148_v47 = vsel %vm146_vm5, %v135_v23, %v137_v13  ;;  %v284_v4 = vsel %vm280_vm0, %v2326_v2, %v2367_v24 }
  0xa9   :  { %v147_v49 = vsel %vm146_vm5, %v133_v25, %v135_v23 }
  0xad   :  { %393 = vrot.lane.b32.xlu1 %v240_v26, %s2042_s0  ;;  %395 = vrot.lane.b32.xlu2 %v241_v27, %s2042_s0 }
  0xae   :  { %391 = vrot.lane.b32.xlu0 %v239_v28, %s2042_s0 }
  0xaf   :  { %v2377_v29 = vpop.permute.xlu1 %140  ;;  %v95_v33 = vpop.permute.xlu2 %94 }
  0xb0   :  { %v139_v34 = vpop.permute.xlu0 %138 }
  0xb1   :  { %v149_v48 = vsel %vm146_vm5, %v137_v13, %v139_v34  ;;  %v150_v55 = vsel %vm146_vm5, %v139_v34, %v2377_v29 }
  0xb5   :  { %377 = vrot.lane.b32.xlu1 %v190_v35, %s2042_s0  ;;  %379 = vrot.lane.b32.xlu2 %v191_v36, %s2042_s0 }
  0xb6   :  { %375 = vrot.lane.b32.xlu0 %v178_v15, %s2042_s0 }
  0xb7   :  { %v114_v39 = vpop.permute.xlu1 %113  ;;  %v2384_v40 = vpop.permute.xlu2 %276 }
  0xb8   :  { %v112_v41 = vpop.permute.xlu0 %111  ;;  %v127_v59 = vsel %vm125_vm6, %v114_v39, %v116_v22  ;;  %v285_v18 = vsel %vm280_vm0, %v2367_v24, %v2384_v40 }
  0xb9   :  { %v126_v61 = vsel %vm125_vm6, %v112_v41, %v114_v39 }
  0xbd   :  { %431 = vrot.lane.b32.xlu1 %v288_v20, %s2042_s0  ;;  %433 = vrot.lane.b32.xlu2 %v302_v42, %s2042_s0 }
  0xbe   :  { %381 = vrot.lane.b32.xlu0 %v192_v43, %s2042_s0 }
  0xbf   :  { %v2393_v44 = vpop.permute.xlu1 %119  ;;  %v2395_v45 = vpop.permute.xlu2 %232 }
  0xc0   :  { %v118_v46 = vpop.permute.xlu0 %117 }
  0xc1   :  { %v128_v60 = vsel %vm125_vm6, %v116_v22, %v118_v46  ;;  %v129_v5 = vsel %vm125_vm6, %v118_v46, %v2393_v44 }
  0xc5   :  { %363 = vrot.lane.b32.xlu1 %v148_v47, %s2042_s0  ;;  %365 = vrot.lane.b32.xlu2 %v149_v48, %s2042_s0 }
  0xc6   :  { %361 = vrot.lane.b32.xlu0 %v147_v49, %s2042_s0 }
  0xc7   :  { %v93_v50 = vpop.permute.xlu1 %92  ;;  %v2403_v52 = vpop.permute.xlu2 %185 }
  0xc8   :  { %v91_v53 = vpop.permute.xlu0 %90  ;;  %v106_v2 = vsel %vm104_vm7, %v93_v50, %v95_v33 }
  0xc9   :  { %v105_v6 = vsel %vm104_vm7, %v91_v53, %v93_v50 }
  0xcd   :  { %435 = vrot.lane.b32.xlu1 %v303_v54, %s2042_s0  ;;  %299 = vrot.lane.b32.xlu2 %v2283_v51, %s2038_s12 }
  0xce   :  { %367 = vrot.lane.b32.xlu0 %v150_v55, %s2042_s0 }
  0xcf   :  { %v2414_v56 = vpop.permute.xlu1 %98  ;;  %v2416_v57 = vpop.permute.xlu2 %257 }
  0xd0   :  { %v97_v58 = vpop.permute.xlu0 %96 }
  0xd1   :  { %v107_v11 = vsel %vm104_vm7, %v95_v33, %v97_v58  ;;  %v108_v12 = vsel %vm104_vm7, %v97_v58, %v2414_v56  ;;  %v193_v33 = vsel %vm189_vm3, %v2359_v21, %v2403_v52 }
  0xd5   :  { %349 = vrot.lane.b32.xlu1 %v127_v59, %s2042_s0  ;;  %351 = vrot.lane.b32.xlu2 %v128_v60, %s2042_s0 }
  0xd6   :  { %347 = vrot.lane.b32.xlu0 %v126_v61, %s2042_s0 }
  0xd7   :  { %v256_v51 = vpop.permute.xlu1 %255  ;;  %v2424_v62 = vpop.permute.xlu2 %236 }
  0xd8   :  { %v254_v3 = vpop.permute.xlu0 %253  ;;  %v265_v21 = vsel %vm259_vm1, %v256_v51, %v2416_v57 }
  0xd9   :  { %v263_v17 = vsel %vm259_vm1, %v2333_v7, %v254_v3 }
  0xdd   :  { %425 = vrot.lane.b32.xlu1 %v284_v4, %s2042_s0  ;;  %333 = vrot.lane.b32.xlu2 %v105_v6, %s2042_s0 }
  0xde   :  { %353 = vrot.lane.b32.xlu0 %v129_v5, %s2042_s0 }
  0xdf   :  { %v279_v8 = vpop.permute.xlu1 %278  ;;  %v2435_v9 = vpop.permute.xlu2 %421 }
  0xe0   :  { %v235_v10 = vpop.permute.xlu0 %234  ;;  %v286_v34 = vsel %vm280_vm0, %v2384_v40, %v279_v8 }
  0xe5   :  { %337 = vrot.lane.b32.xlu1 %v107_v11, %s2042_s0  ;;  %339 = vrot.lane.b32.xlu2 %v108_v12, %s2042_s0 }
  0xe6   :  { %335 = vrot.lane.b32.xlu0 %v106_v2, %s2042_s0 }
  0xe7   :  { %v188_v13 = vpop.permute.xlu1 %187  ;;  %v2444_v14 = vpop.permute.xlu2 %123 }
  0xe8   :  { %v2446_v15 = vpop.permute.xlu0 %293 }
  0xed   :  { %411 = vrot.lane.b32.xlu1 %v263_v17, %s2042_s0  ;;  %319 = vrot.lane.b32.xlu2 %v2197_v32, %s2042_s0 }
  0xee   :  { %427 = vrot.lane.b32.xlu0 %v285_v18, %s2042_s0 }
  0xef   :  { %v2457_v19 = vpop.permute.xlu1 %144  ;;  %v404_v20 = vpop.permute.xlu2 %403 }
  0xf0   :  { %v143_v22 = vpop.permute.xlu0 %142 }
  0xf1   :  { %v151_v41 = vsel %vm146_vm5, %v2377_v29, %v143_v22  ;;  %v244_v29 = vsel %vm238_vm2, %v235_v10, %v2424_v62  ;;  %v152_v47 = vsel %vm146_vm5, %v143_v22, %v2457_v19 }
  0xf5   :  { %323 = vrot.lane.b32.xlu1 %v2195_v31, %s2042_s0  ;;  %325 = vrot.lane.b32.xlu2 %v2219_v38, %s2042_s0  ;;  %v242_v31 = vsel %vm238_vm2, %v2314_v63, %v2395_v45  ;;  %v264_v38 = vsel %vm259_vm1, %v254_v3, %v256_v51  ;;  %v304_v63 = vsel %vm301_vm4, %v2349_v16, %v2446_v15 }
  0xf6   :  { %321 = vrot.lane.b32.xlu0 %v2193_v30, %s2042_s0  ;;  %v243_v30 = vsel %vm238_vm2, %v2395_v45, %v235_v10  ;;  %v194_v16 = vsel %vm189_vm3, %v2403_v52, %v188_v13 }
  0xf7   :  { %v420_v7 = vpop.permute.xlu1 %419  ;;  %v2465_v23 = vpop.permute.xlu2 %409 }
  0xf8   :  { %v418_v24 = vpop.permute.xlu0 %417  ;;  %v489_v32 = vsel %vm445_vm8, %v420_v7, %v2435_v9 }
  0xf9   :  { %v488_v25 = vsel %vm445_vm8, %v418_v24, %v420_v7  ;;  %586 = vmatpush.bf16.msra.mxu2 %v489_v32  ;;  %v1993_v7 = vld [vmem:[%s3310_s1 + $0x4] sm:$0xf]  ;;  %v1871_v24 = vld [vmem:[%s3310_s1 + $0x8] sm:$0xf0] }
  0xfa   :  { %558 = vmatpush.bf16.msra.mxu0 %v488_v25  ;;  %v2580_v25 = vor.u32 %v1993_v7, %v1871_v24 }
  0xfd   :  { %397 = vrot.lane.b32.xlu1 %v242_v31, %s2042_s0  ;;  %399 = vrot.lane.b32.xlu2 %v243_v30, %s2042_s0 }
  0xfe   :  { %413 = vrot.lane.b32.xlu0 %v264_v38, %s2042_s0 }
  0xff   :  { %v122_v26 = vpop.permute.xlu1 %121  ;;  %v390_v27 = vpop.permute.xlu2 %389 }
 0x100   :  { %v2479_v28 = vpop.permute.xlu0 %423  ;;  %v130_v48 = vsel %vm125_vm6, %v2393_v44, %v122_v26  ;;  %v131_v53 = vsel %vm125_vm6, %v122_v26, %v2444_v14 }
 0x101   :  { %v490_v2 = vsel %vm445_vm8, %v2435_v9, %v2479_v28 }
 0x105   :  { %383 = vrot.lane.b32.xlu1 %v193_v33, %s2042_s0  ;;  %437 = vrot.lane.b32.xlu2 %v304_v63, %s2042_s0 }
 0x106   :  { %429 = vrot.lane.b32.xlu0 %v286_v34, %s2042_s0 }
 0x107   :  { %v2492_v35 = vpop.permute.xlu1 %297  ;;  %v2494_v36 = vpop.permute.xlu2 %395 }
 0x108   :  { %v296_v39 = vpop.permute.xlu0 %295 }
 0x109   :  { %v305_v54 = vsel %vm301_vm4, %v2446_v15, %v296_v39  ;;  %v306_v61 = vsel %vm301_vm4, %v296_v39, %v2492_v35 }
 0x10d   :  { %415 = vrot.lane.b32.xlu1 %v265_v21, %s2042_s0  ;;  %369 = vrot.lane.b32.xlu2 %v151_v41, %s2042_s0 }
 0x10e   :  { %385 = vrot.lane.b32.xlu0 %v194_v16, %s2042_s0 }
 0x10f   :  { %v408_v40 = vpop.permute.xlu1 %407  ;;  %v2505_v42 = vpop.permute.xlu2 %379 }
 0x110   :  { %v406_v43 = vpop.permute.xlu0 %405 }
 0x111   :  { %v482_v45 = vsel %vm445_vm8, %v404_v20, %v406_v43  ;;  %v483_v46 = vsel %vm445_vm8, %v406_v43, %v408_v40 }
 0x112   :  { %559 = vmatpush.bf16.msra.mxu0 %v482_v45  ;;  %587 = vmatpush.bf16.msra.mxu2 %v483_v46 }
 0x115   :  { %401 = vrot.lane.b32.xlu1 %v244_v29, %s2042_s0  ;;  %355 = vrot.lane.b32.xlu2 %v130_v48, %s2042_s0 }
 0x116   :  { %371 = vrot.lane.b32.xlu0 %v152_v47, %s2042_s0 }
 0x117   :  { %v103_v49 = vpop.permute.xlu1 %102  ;;  %v434_v50 = vpop.permute.xlu2 %433 }
 0x118   :  { %v101_v52 = vpop.permute.xlu0 %100 }
 0x119   :  { %v109_v60 = vsel %vm104_vm7, %v2414_v56, %v101_v52  ;;  %v110_v51 = vsel %vm104_vm7, %v101_v52, %v103_v49 }
 0x11d   :  { %387 = vrot.lane.b32.xlu1 %v188_v13, %s2042_s0  ;;  %439 = vrot.lane.b32.xlu2 %v305_v54, %s2042_s0 }
 0x11e   :  { %357 = vrot.lane.b32.xlu0 %v131_v53, %s2042_s0 }
 0x11f   :  { %v394_v44 = vpop.permute.xlu1 %393  ;;  %v366_v55 = vpop.permute.xlu2 %365 }
 0x120   :  { %v392_v57 = vpop.permute.xlu0 %391  ;;  %v478_v17 = vsel %vm445_vm8, %v394_v44, %v2494_v36 }
 0x121   :  { %v476_v58 = vsel %vm445_vm8, %v390_v27, %v392_v57  ;;  %v477_v59 = vsel %vm445_vm8, %v392_v57, %v394_v44 }
 0x122   :  { %560 = vmatpush.bf16.msra.mxu0 %v476_v58  ;;  %588 = vmatpush.bf16.msra.mxu2 %v477_v59 }
 0x125   :  { %341 = vrot.lane.b32.xlu1 %v109_v60, %s2042_s0  ;;  %343 = vrot.lane.b32.xlu2 %v110_v51, %s2042_s0 }
 0x126   :  { %441 = vrot.lane.b32.xlu0 %v306_v61, %s2042_s0 }
 0x127   :  { %v378_v62 = vpop.permute.xlu1 %377  ;;  %v300_v3 = vpop.permute.xlu2 %299 }
 0x128   :  { %v376_v4 = vpop.permute.xlu0 %375  ;;  %v471_v5 = vsel %vm445_vm8, %v378_v62, %v2505_v42 }
 0x129   :  { %v470_v6 = vsel %vm445_vm8, %v376_v4, %v378_v62  ;;  %589 = vmatpush.bf16.msra.mxu2 %v471_v5 }
 0x12a   :  { %561 = vmatpush.bf16.msra.mxu0 %v470_v6 }
 0x12d   :  { %327 = vrot.lane.b32.xlu1 %v2217_v37, %s2042_s0  ;;  %329 = vrot.lane.b32.xlu2 %v2318_v1, %s2042_s0  ;;  %v484_v37 = vsel %vm445_vm8, %v408_v40, %v2465_v23 }
 0x12e   :  { %373 = vrot.lane.b32.xlu0 %v2457_v19, %s2042_s0 }
 0x12f   :  { %v432_v56 = vpop.permute.xlu1 %431  ;;  %v352_v8 = vpop.permute.xlu2 %351 }
 0x130   :  { %v2544_v10 = vpop.permute.xlu0 %381  ;;  %v494_v11 = vsel %vm445_vm8, %v432_v56, %v434_v50 }
 0x131   :  { %579 = vmatpush.bf16.msra.mxu1 %v494_v11  ;;  %v472_v18 = vsel %vm445_vm8, %v2505_v42, %v2544_v10 }
 0x134   :  { %1875 = vmatmul.msk.bf16.vlgmr.msra.gmra.mxu1 %vm554_vm9, %v2580_v25 }
 0x135   :  { %614 = vmatpush.bf16.msrb.mxu1 %v490_v2  ;;  %345 = vrot.lane.b32.xlu1 %v103_v49, %s2042_s0  ;;  %v1869_v49 = vld [vmem:[%s3310_s1] sm:$0xf] }
 0x136   :  { %359 = vrot.lane.b32.xlu0 %v2444_v14, %s2042_s0  ;;  %331 = vrot.lane.b32.xlu2 %v2316_v0, %s2042_s0  ;;  %v307_v14 = vsel %vm301_vm4, %v2492_v35, %v300_v3 }
 0x137   :  { %v364_v1 = vpop.permute.xlu1 %363  ;;  %v334_v13 = vpop.permute.xlu2 %333 }
 0x138   :  { %v362_v12 = vpop.permute.xlu0 %361  ;;  %v465_v15 = vsel %vm445_vm8, %v364_v1, %v366_v55 }
 0x139   :  { %615 = vmatpush.bf16.msrb.mxu1 %v484_v37  ;;  %v464_v9 = vsel %vm445_vm8, %v362_v12, %v364_v1  ;;  %590 = vmatpush.bf16.msra.mxu2 %v465_v15 }
 0x13a   :  { %562 = vmatpush.bf16.msra.mxu0 %v464_v9 }
 0x13d   :  { %616 = vmatpush.bf16.msrb.mxu1 %v478_v17 }
 0x13e   :  { %443 = vrot.lane.b32.xlu0 %v307_v14, %s2042_s0 }
 0x13f   :  { %v436_v0 = vpop.permute.xlu1 %435  ;;  %v2569_v20 = vpop.permute.xlu2 %339 }
 0x140   :  { %v2567_v19 = vpop.permute.xlu0 %367  ;;  %v495_v22 = vsel %vm445_vm8, %v434_v50, %v436_v0  ;;  %v1994_v50 = vld [vmem:[%s3310_s1 + $0x4] sm:$0xf0] }
 0x141   :  { %617 = vmatpush.bf16.msrb.mxu1 %v472_v18  ;;  %607 = vmatpush.bf16.msra.mxu3 %v495_v22  ;;  %v466_v32 = vsel %vm445_vm8, %v366_v55, %v2567_v19 }
 0x144   :  { %1876 = vmatmul.msk.bf16.vlgmr.msra.gmra.mxu3 %vm554_vm9, %v2580_v25 }
 0x145   :  { %618 = vmatpush.bf16.msrb.mxu1 %v466_v32 }
 0x147   :  { %v350_v31 = vpop.permute.xlu1 %349  ;;  %v320_v38 = vpop.permute.xlu2 %319 }
 0x148   :  { %v348_v30 = vpop.permute.xlu0 %347  ;;  %v459_v26 = vsel %vm445_vm8, %v350_v31, %v352_v8 }
 0x149   :  { %v458_v27 = vsel %vm445_vm8, %v348_v30, %v350_v31  ;;  %591 = vmatpush.bf16.msra.mxu2 %v459_v26 }
 0x14a   :  { %563 = vmatpush.bf16.msra.mxu0 %v458_v27 }
 0x14f   :  { %v426_v33 = vpop.permute.xlu1 %425  ;;  %v2590_v34 = vpop.permute.xlu2 %325 }
 0x150   :  { %v2588_v63 = vpop.permute.xlu0 %353  ;;  %v491_v47 = vsel %vm445_vm8, %v2479_v28, %v426_v33 }
 0x151   :  { %v460_v35 = vsel %vm445_vm8, %v352_v8, %v2588_v63 }
 0x152   :  { %619 = vmatpush.bf16.msrb.mxu1 %v460_v35 }
 0x157   :  { %v338_v39 = vpop.permute.xlu1 %337  ;;  %v2594_v41 = vpop.permute.xlu2 %399 }
 0x158   :  { %v336_v21 = vpop.permute.xlu0 %335  ;;  %v454_v16 = vsel %vm445_vm8, %v338_v39, %v2569_v20 }
 0x159   :  { %v452_v40 = vsel %vm445_vm8, %v334_v13, %v336_v21  ;;  %v453_v42 = vsel %vm445_vm8, %v336_v21, %v338_v39  ;;  %620 = vmatpush.bf16.msrb.mxu1 %v454_v16  ;;  %v2043_v16 = vmov 0  }
 0x15a   :  { %564 = vmatpush.bf16.msra.mxu0 %v452_v40  ;;  %592 = vmatpush.bf16.msra.mxu2 %v453_v42  ;;  %906 = vst [vmem:[#allocation2] sm:$0xf] %v2043_v16 }
 0x15b   :  { %2025 = vset.pattern.permute.xlu1 %v2043_v16  ;;  %2026 = vset.pattern.permute.xlu0 %v2043_v16  ;;  %907 = vst [vmem:[#allocation2 + $0x20] sm:$0xf] %v2043_v16 }
 0x15c   :  { %2027 = vset.pattern.permute.xlu2 %v2043_v16  ;;  %908 = vst [vmem:[#allocation2 + $0x1c] sm:$0xf] %v2043_v16 }
 0x15d   :  { %909 = vst [vmem:[#allocation2 + $0x3c] sm:$0xf] %v2043_v16 }
 0x15f   :  { %v412_v43 = vpop.permute.xlu1 %411  ;;  %v438_v46 = vpop.permute.xlu2 %437 }
 0x160   :  { %v428_v45 = vpop.permute.xlu0 %427  ;;  %v496_v29 = vsel %vm445_vm8, %v436_v0, %v438_v46  ;;  %v485_v48 = vsel %vm445_vm8, %v2465_v23, %v412_v43  ;;  %v2617_v23 = vor.u32 %v1994_v50, %v1869_v49 }
 0x161   :  { %635 = vmatpush.bf16.msrb.mxu3 %v496_v29  ;;  %v492_v57 = vsel %vm445_vm8, %v426_v33, %v428_v45 }
 0x163   :  { %v1959_v29 = vld [vmem:[#allocation2 + $0x1c] sm:$0xf] }
 0x164   :  { %1877 = vmatmul.msk.bf16.vlgmr.msrb.gmra.mxu3 %vm554_vm9, %v2580_v25 }
 0x165   :  { %642 = vmatpush.bf16.msra.mxu3 %v491_v47  ;;  %v2014_v47 = vld [vmem:[#allocation2 + $0x38] sm:$0xf0] }
 0x167   :  { %v324_v52 = vpop.permute.xlu1 %323  ;;  %v370_v54 = vpop.permute.xlu2 %369 }
 0x168   :  { %v322_v53 = vpop.permute.xlu0 %321  ;;  %v448_v28 = vsel %vm445_vm8, %v324_v52, %v2590_v34 }
 0x169   :  { %643 = vmatpush.bf16.msra.mxu3 %v485_v48  ;;  %v446_v44 = vsel %vm445_vm8, %v320_v38, %v322_v53  ;;  %v447_v55 = vsel %vm445_vm8, %v322_v53, %v324_v52  ;;  %621 = vmatpush.bf16.msrb.mxu1 %v448_v28  ;;  %v1960_v48 = vor.u32 %v2014_v47, %v1959_v29  ;;  %v36_v28 = vld [vmem:[%s3311_s9] sm:$0x3f] }
 0x16a   :  { %565 = vmatpush.bf16.msra.mxu0 %v446_v44  ;;  %593 = vmatpush.bf16.msra.mxu2 %v447_v55  ;;  %v37_v55 = vunpack.c.l.bf16 %v36_v28 }
 0x16c   :  { %622 = vmatmul.bf16.vlgmr.msrb.gmra.mxu1 %v2617_v23 }
 0x16d   :  { %594 = vmatmul.bf16.vlgmr.msra.gmra.mxu2 %v2617_v23  ;;  %566 = vmatmul.bf16.vlgmr.msra.gmra.mxu0 %v2617_v23 }
 0x16e   :  { %670 = vmatpush.bf16.msrb.mxu2 %v492_v57 }
 0x16f   :  { %v398_v58 = vpop.permute.xlu1 %397  ;;  %v356_v60 = vpop.permute.xlu2 %355 }
 0x170   :  { %v414_v59 = vpop.permute.xlu0 %413  ;;  %v479_v61 = vsel %vm445_vm8, %v2494_v36, %v398_v58  ;;  %v480_v62 = vsel %vm445_vm8, %v398_v58, %v2594_v41  ;;  %v467_v36 = vsel %vm445_vm8, %v2567_v19, %v370_v54  ;;  %v461_v37 = vsel %vm445_vm8, %v2588_v63, %v356_v60 }
 0x171   :  { %644 = vmatpush.bf16.msra.mxu3 %v479_v61  ;;  %v486_v51 = vsel %vm445_vm8, %v412_v43, %v414_v59  ;;  %v1883_v43 = vld [vmem:[#allocation2] sm:$0xf] }
 0x172   :  { %671 = vmatpush.bf16.msrb.mxu2 %v486_v51 }
 0x176   :  { %672 = vmatpush.bf16.msrb.mxu2 %v480_v62 }
 0x177   :  { %v384_v3 = vpop.permute.xlu1 %383  ;;  %v440_v5 = vpop.permute.xlu2 %439 }
 0x178   :  { %v430_v4 = vpop.permute.xlu0 %429  ;;  %v473_v6 = vsel %vm445_vm8, %v2544_v10, %v384_v3  ;;  %v497_v8 = vsel %vm445_vm8, %v438_v46, %v440_v5 }
 0x179   :  { %v493_v56 = vsel %vm445_vm8, %v428_v45, %v430_v4  ;;  %645 = vmatpush.bf16.msra.mxu3 %v473_v6  ;;  %663 = vmatpush.bf16.msrb.mxu0 %v497_v8  ;;  %v1998_v45 = vld [vmem:[#allocation2 + $0x1c] sm:$0xf0]  ;;  %v730_v6 = vperm.slane %v37_v55, 4 }
 0x17a   :  { %v1884_v46 = vor.u32 %v1998_v45, %v1883_v43 }
 0x17c   :  { %973 = vrot.lane.b32.xlu0 %v1884_v46, %s2041_s27  ;;  %993 = vrot.lane.b32.xlu1 %v1884_v46, %s2040_s19 }
 0x17d   :  { %698 = vmatpush.bf16.msra.mxu0 %v493_v56  ;;  %646 = vmatpush.bf16.msra.mxu3 %v467_v36  ;;  %v731_v36 = vperm.slane %v37_v55, 6 }
 0x17e   :  { %1878 = vmatmul.msk.bf16.vlgmr.msrb.gmra.mxu0 %vm554_vm9, %v2580_v25  ;;  %1013 = vrot.lane.b32.xlu2 %v1884_v46, %s2039_s28 }
 0x17f   :  { %v416_v11 = vpop.permute.xlu1 %415  ;;  %v344_v19 = vpop.permute.xlu2 %343 }
 0x180   :  { %v386_v2 = vpop.permute.xlu0 %385  ;;  %v487_v10 = vsel %vm445_vm8, %v414_v59, %v416_v11  ;;  %v728_v59 = vperm.slane %v37_v55, 0 }
 0x181   :  { %647 = vmatpush.bf16.msra.mxu3 %v461_v37  ;;  %v474_v1 = vsel %vm445_vm8, %v384_v3, %v386_v2  ;;  %699 = vmatpush.bf16.msra.mxu0 %v487_v10  ;;  %v2689_v10 = vperm.slane %v730_v6, 0 }
 0x182   :  { %673 = vmatpush.bf16.msrb.mxu2 %v474_v1  ;;  %v2675_v61 = vperm.slane %v728_v59, 0  ;;  %v38_v1 = vunpack.c.h.bf16 %v36_v28 }
 0x184   :  { %1135 = vrot.lane.b32.xlu0 %v1960_v48, %s2035_s22  ;;  %1155 = vrot.lane.b32.xlu1 %v1960_v48, %s2034_s21 }
 0x187   :  { %v402_v12 = vpop.permute.xlu1 %401  ;;  %v330_v30 = vpop.permute.xlu2 %329 }
 0x188   :  { %v372_v13 = vpop.permute.xlu0 %371  ;;  %v481_v15 = vsel %vm445_vm8, %v2594_v41, %v402_v12 }
 0x189   :  { %v468_v9 = vsel %vm445_vm8, %v370_v54, %v372_v13  ;;  %700 = vmatpush.bf16.msra.mxu0 %v481_v15 }
 0x18a   :  { %674 = vmatpush.bf16.msrb.mxu2 %v468_v9 }
 0x18c   :  { %1115 = vrot.lane.b32.xlu0 %v1960_v48, %s2036_s11  ;;  %1190 = vrot.lane.b32.xlu1 %v1884_v46, %s2042_s0 }
 0x18f   :  { %v388_v17 = vpop.permute.xlu1 %387 }
 0x190   :  { %v358_v14 = vpop.permute.xlu0 %357  ;;  %v475_v18 = vsel %vm445_vm8, %v386_v2, %v388_v17  ;;  %v332_v41 = vpop.permute.xlu2 %331 }
 0x191   :  { %v462_v0 = vsel %vm445_vm8, %v356_v60, %v358_v14  ;;  %701 = vmatpush.bf16.msra.mxu0 %v475_v18  ;;  %v451_v42 = vsel %vm445_vm8, %v330_v30, %v332_v41  ;;  %v729_v60 = vperm.slane %v37_v55, 2 }
 0x192   :  { %675 = vmatpush.bf16.msrb.mxu2 %v462_v0  ;;  %v732_v0 = vperm.slane %v38_v1, 0 }
 0x194   :  { %1175 = vrot.lane.b32.xlu0 %v1960_v48, %s2038_s12 }
 0x197   :  { %v342_v22 = vpop.permute.xlu1 %341 }
 0x198   :  { %v442_v7 = vpop.permute.xlu0 %441  ;;  %v455_v24 = vsel %vm445_vm8, %v2569_v20, %v342_v22  ;;  %v456_v32 = vsel %vm445_vm8, %v342_v22, %v344_v19 }
 0x199   :  { %v498_v31 = vsel %vm445_vm8, %v440_v5, %v442_v7  ;;  %648 = vmatpush.bf16.msra.mxu3 %v455_v24  ;;  %676 = vmatpush.bf16.msrb.mxu2 %v456_v32  ;;  %v2681_v5 = vperm.slane %v729_v60, 0 }
 0x19a   :  { %691 = vmatpush.bf16.msra.mxu1 %v498_v31 }
 0x19d   :  { %1879 = vmatmul.msk.bf16.vlgmr.msra.gmra.mxu1 %vm554_vm9, %v2580_v25 }
 0x19f   :  { %v328_v38 = vpop.permute.xlu1 %327 }
 0x1a0   :  { %v374_v26 = vpop.permute.xlu0 %373  ;;  %v449_v27 = vsel %vm445_vm8, %v2590_v34, %v328_v38  ;;  %v450_v33 = vsel %vm445_vm8, %v328_v38, %v330_v30 }
 0x1a1   :  { %649 = vmatpush.bf16.msra.mxu3 %v449_v27  ;;  %677 = vmatpush.bf16.msrb.mxu2 %v450_v33  ;;  %v469_v20 = vsel %vm445_vm8, %v372_v13, %v374_v26  ;;  %v2691_v13 = vperm.slane %v731_v36, 0  ;;  %v2705_v27 = vperm.slane %v732_v0, 0  ;;  %v733_v33 = vperm.slane %v38_v1, 2 }
 0x1a2   :  { %702 = vmatpush.bf16.msra.mxu0 %v469_v20 }
 0x1a3   :  { %v2717_v43 = vperm.slane %v733_v33, 0 }
 0x1a4   :  { %650 = vmatmul.bf16.vlgmr.msra.gmra.mxu3 %v2617_v23  ;;  %678 = vmatmul.bf16.vlgmr.msrb.gmra.mxu2 %v2617_v23 }
 0x1a7   :  { %v346_v39 = vpop.permute.xlu1 %345 }
 0x1a8   :  { %v360_v63 = vpop.permute.xlu0 %359  ;;  %v457_v21 = vsel %vm445_vm8, %v344_v19, %v346_v39 }
 0x1a9   :  { %v463_v35 = vsel %vm445_vm8, %v358_v14, %v360_v63 }
 0x1aa   :  { %703 = vmatpush.bf16.msra.mxu0 %v463_v35 }
 0x1ae   :  { %704 = vmatpush.bf16.msra.mxu0 %v457_v21 }
 0x1b0   :  { %v444_v34 = vpop.permute.xlu0 %443 }
 0x1b1   :  { %v499_v40 = vsel %vm445_vm8, %v442_v7, %v444_v34 }
 0x1b2   :  { %705 = vmatpush.bf16.msra.mxu0 %v451_v42  ;;  %719 = vmatpush.bf16.msrb.mxu1 %v499_v40 }
 0x1b5   :  { %706 = vmatmul.bf16.vlgmr.msra.gmra.mxu0 %v2617_v23  ;;  %1880 = vmatmul.msk.bf16.vlgmr.msrb.gmra.mxu1 %vm554_vm9, %v2580_v25  ;;  %v581_v25 = vpop.f32.mrf.mxu1 }
 0x1bd   :  { %v583_v50 = vpop.f32.mrf.mxu1 }
 0x1c7   :  { %v609_v49 = vpop.f32.mrf.mxu3 }
 0x1cf   :  { %v611_v52 = vpop.f32.mrf.mxu3 }
 0x1e7   :  { %v637_v44 = vpop.f32.mrf.mxu3 }
 0x1e9   :  { %v623_v54 = vpop.f32.mrf.mxu1 }
 0x1ea   :  { %v567_v53 = vpop.f32.mrf.mxu0  ;;  %v2687_v37 = vadd.f32 %v637_v44, %v623_v54 }
 0x1eb   :  { %v2677_v3 = vadd.f32 %v581_v25, %v567_v53 }
 0x1ec   :  { %v748_v17 = vmul.f32 %v2689_v10, %v2687_v37 }
 0x1ed   :  { %v746_v11 = vmul.f32 %v2675_v61, %v2677_v3 }
 0x1ee   :  { %v776_v38 = vmul.f32 %v748_v17, %v748_v17 }
 0x1ef   :  { %v639_v51 = vpop.f32.mrf.mxu3  ;;  %v774_v15 = vmul.f32 %v746_v11, %v746_v11 }
 0x1f0   :  { %v595_v57 = vpop.f32.mrf.mxu2 }
 0x1f1   :  { %v625_v58 = vpop.f32.mrf.mxu1  ;;  %v2679_v4 = vadd.f32 %v609_v49, %v595_v57 }
 0x1f2   :  { %v569_v23 = vpop.f32.mrf.mxu0  ;;  %v2711_v35 = vadd.f32 %v639_v51, %v625_v58 }
 0x1f3   :  { %v747_v2 = vmul.f32 %v2681_v5, %v2679_v4  ;;  %v2697_v19 = vadd.f32 %v583_v50, %v569_v23 }
 0x1f4   :  { %v754_v46 = vmul.f32 %v2689_v10, %v2711_v35 }
 0x1f5   :  { %v775_v9 = vmul.f32 %v747_v2, %v747_v2  ;;  %v758_v32 = vadd.f32 %v747_v2, %v746_v11  ;;  %v752_v20 = vmul.f32 %v2675_v61, %v2697_v19 }
 0x1f7   :  { %v786_v30 = vadd.f32 %v775_v9, %v774_v15  ;;  %v759_v39 = vadd.f32 %v758_v32, %v748_v17  ;;  %v780_v28 = vmul.f32 %v752_v20, %v752_v20  ;;  %v2735_v32 = vpop.permute.xlu0 %973 }
 0x1f8   :  { %v597_v8 = vpop.f32.mrf.mxu2 }
 0x1f9   :  { %v2699_v22 = vadd.f32 %v611_v52, %v597_v8  ;;  %v787_v34 = vadd.f32 %v786_v30, %v776_v38  ;;  %v782_v8 = vmul.f32 %v754_v46, %v754_v46 }
 0x1fb   :  { %v665_v62 = vpop.f32.mrf.mxu0  ;;  %v753_v63 = vmul.f32 %v2681_v5, %v2699_v22 }
 0x1fd   :  { %v765_v45 = vadd.f32 %v753_v63, %v752_v20  ;;  %v781_v44 = vmul.f32 %v753_v63, %v753_v63 }
 0x1ff   :  { %v766_v55 = vadd.f32 %v765_v45, %v754_v46  ;;  %v2739_v30 = vpop.permute.xlu0 %1135 }
 0x203   :  { %v667_v18 = vpop.f32.mrf.mxu0 }
 0x207   :  { %v2743_v33 = vpop.permute.xlu0 %1115 }
 0x20f   :  { %v2747_v63 = vpop.permute.xlu0 %1175 }
 0x21a   :  { %v693_v56 = vpop.f32.mrf.mxu1 }
 0x222   :  { %v695_v7 = vpop.f32.mrf.mxu1 }
 0x227   :  { %v651_v12 = vpop.f32.mrf.mxu3  ;;  %v679_v24 = vpop.f32.mrf.mxu2 }
 0x228   :  { %v2695_v14 = vadd.f32 %v665_v62, %v651_v12  ;;  %v2703_v26 = vadd.f32 %v693_v56, %v679_v24  ;;  %v793_v56 = vadd.f32 %v781_v44, %v780_v28 }
 0x22a   :  { %v749_v31 = vmul.f32 %v2691_v13, %v2695_v14  ;;  %v750_v40 = vmul.f32 %v2705_v27, %v2703_v26  ;;  %v794_v15 = vadd.f32 %v793_v56, %v782_v8 }
 0x22c   :  { %v777_v21 = vmul.f32 %v749_v31, %v749_v31  ;;  %v760_v16 = vadd.f32 %v759_v39, %v749_v31  ;;  %v778_v50 = vmul.f32 %v750_v40, %v750_v40  ;;  %v2737_v31 = vpop.permute.xlu1 %993  ;;  %v2749_v39 = vpop.permute.xlu2 %1013 }
 0x22e   :  { %v788_v25 = vadd.f32 %v787_v34, %v777_v21  ;;  %v761_v54 = vadd.f32 %v760_v16, %v750_v40 }
 0x22f   :  { %v653_v41 = vpop.f32.mrf.mxu3  ;;  %v681_v49 = vpop.f32.mrf.mxu2 }
 0x230   :  { %v2715_v42 = vadd.f32 %v667_v18, %v653_v41  ;;  %v2727_v23 = vadd.f32 %v695_v7, %v681_v49  ;;  %v789_v59 = vadd.f32 %v788_v25, %v778_v50 }
 0x232   :  { %v707_v29 = vpop.f32.mrf.mxu0  ;;  %v721_v47 = vpop.f32.mrf.mxu1  ;;  %v755_v52 = vmul.f32 %v2691_v13, %v2715_v42  ;;  %v756_v36 = vmul.f32 %v2705_v27, %v2727_v23 }
 0x233   :  { %v2721_v48 = vadd.f32 %v721_v47, %v707_v29 }
 0x234   :  { %v767_v60 = vadd.f32 %v766_v55, %v755_v52  ;;  %v783_v2 = vmul.f32 %v755_v52, %v755_v52  ;;  %v784_v18 = vmul.f32 %v756_v36, %v756_v36  ;;  %v2741_v38 = vpop.permute.xlu1 %1155 }
 0x235   :  { %v751_v53 = vmul.f32 %v2717_v43, %v2721_v48 }
 0x236   :  { %v768_v12 = vadd.f32 %v767_v60, %v756_v36  ;;  %v795_v17 = vadd.f32 %v794_v15, %v783_v2  ;;  %v807_v15 = vld [vmem:[%s3312_s2 + $0x8] sm:$0xff] }
 0x237   :  { %v762_v57 = vadd.f32 %v761_v54, %v751_v53  ;;  %v779_v58 = vmul.f32 %v751_v53, %v751_v53 }
 0x238   :  { %v796_v7 = vadd.f32 %v795_v17, %v784_v18 }
 0x239   :  { %763 = vadd.xlane.f32.xlu1 %v762_v57  ;;  %v790_v51 = vadd.f32 %v789_v59, %v779_v58  ;;  %v806_v58 = vld [vmem:[%s3312_s2] sm:$0xff] }
 0x23a   :  { %v709_v62 = vpop.f32.mrf.mxu0  ;;  %v723_v6 = vpop.f32.mrf.mxu1 }
 0x23b   :  { %v2731_v11 = vadd.f32 %v723_v6, %v709_v62  ;;  %791 = vadd.xlane.f32.xlu0 %v790_v51  ;;  %v832_v62 = vld [vmem:[%s3313_s3] sm:$0xff] }
 0x23c   :  { %v2745_v20 = vpop.permute.xlu1 %1190 }
 0x23d   :  { %v757_v1 = vmul.f32 %v2717_v43, %v2731_v11 }
 0x23f   :  { %v769_v9 = vadd.f32 %v768_v12, %v757_v1  ;;  %v785_v0 = vmul.f32 %v757_v1, %v757_v1 }
 0x241   :  { %770 = vadd.xlane.f32.xlu2 %v769_v9  ;;  %v797_v24 = vadd.f32 %v796_v7, %v785_v0  ;;  %v833_v0 = vld [vmem:[%s3313_s3 + $0x8] sm:$0xff] }
 0x249   :  { %798 = vadd.xlane.f32.xlu2 %v797_v24 }
 0x2ac   :  { %v764_v21 = vpop.xlane.xlu1 %763 }
 0x2ad   :  { %v772_v41 = vmul.f32 0.001953125, %v764_v21 }
 0x2ae   :  { %v792_v34 = vpop.xlane.xlu0 %791 }
 0x2af   :  { %v802_v16 = vmul.f32 %v772_v41, %v772_v41  ;;  %v800_v40 = vmul.f32 0.001953125, %v792_v34 }
 0x2b1   :  { %v804_v45 = vsub.f32 %v800_v40, %v802_v16 }
 0x2b3   :  { %v808_v46 = vadd.f32 1e-05, %v804_v45 }
 0x2b4   :  { %v771_v29 = vpop.xlane.xlu2 %770 }
 0x2b5   :  { %2028 = vrsqrt.f32 %v808_v46  ;;  %v773_v47 = vmul.f32 0.001953125, %v771_v29  ;;  %vm816_vm11 = vweird.f32 %v808_v46 }
 0x2b7   :  { %v803_v52 = vmul.f32 %v773_v47, %v773_v47 }
 0x2bb   :  { %v2029_v25 = vpop.eup %2028 }
 0x2bc   :  { %v811_v49 = vmul.f32 %v2029_v25, %v808_v46  ;;  %v799_v50 = vpop.xlane.xlu2 %798  ;;  %vm817_vm10 = vweird.f32 %v2029_v25 }
 0x2bd   :  { %v801_v53 = vmul.f32 0.001953125, %v799_v50  ;;  %vm818_vm12 = vmor %vm816_vm11, %vm817_vm10 }
 0x2be   :  { %v812_v54 = vmul.f32 %v2029_v25, %v811_v49 }
 0x2bf   :  { %v805_v28 = vsub.f32 %v801_v53, %v803_v52 }
 0x2c0   :  { %v813_v44 = vmul.f32 0.5, %v812_v54 }
 0x2c1   :  { %v809_v55 = vadd.f32 1e-05, %v805_v28 }
 0x2c2   :  { %v814_v57 = vsub.f32 1.5, %v813_v44 }
 0x2c3   :  { %2030 = vrsqrt.f32 %v809_v55  ;;  %vm826_vm14 = vweird.f32 %v809_v55 }
 0x2c4   :  { %v815_v59 = vmul.f32 %v2029_v25, %v814_v57 }
 0x2c6   :  { %v819_v60 = vsel %vm818_vm12, %v2029_v25, %v815_v59 }
 0x2c7   :  { %v830_v51 = vmul.f32 %v819_v60, %v806_v58 }
 0x2c9   :  { %v2031_v6 = vpop.eup %2030  ;;  %840 = vperm.xlu1 %2025, %v830_v51   ;;  %v834_v56 = vmul.f32 %v830_v51, %v772_v41 }
 0x2ca   :  { %v821_v8 = vmul.f32 %v2031_v6, %v809_v55  ;;  %vm827_vm13 = vweird.f32 %v2031_v6 }
 0x2cb   :  { %v836_v36 = vsub.f32 %v832_v62, %v834_v56  ;;  %vm828_vm15 = vmor %vm826_vm14, %vm827_vm13 }
 0x2cc   :  { %v822_v2 = vmul.f32 %v2031_v6, %v821_v8 }
 0x2cd   :  { %862 = vperm.xlu0 %2026, %v836_v36  }
 0x2ce   :  { %v823_v1 = vmul.f32 0.5, %v822_v2 }
 0x2d0   :  { %v824_v12 = vsub.f32 1.5, %v823_v1 }
 0x2d2   :  { %v825_v9 = vmul.f32 %v2031_v6, %v824_v12 }
 0x2d4   :  { %v829_v17 = vsel %vm828_vm15, %v2031_v6, %v825_v9 }
 0x2d5   :  { %v831_v18 = vmul.f32 %v829_v17, %v807_v15 }
 0x2d7   :  { %845 = vperm.xlu2 %2027, %v831_v18   ;;  %v835_v7 = vmul.f32 %v831_v18, %v773_v47 }
 0x2d9   :  { %v837_v24 = vsub.f32 %v833_v0, %v835_v7 }
 0x2db   :  { %867 = vperm.xlu1 %2025, %v837_v24  }
 0x331   :  { %v846_v62 = vpop.permute.xlu2 %845 }
 0x332   :  { %v854_v6 = vmul.f32 %v846_v62, %v2697_v19  ;;  %v855_v56 = vmul.f32 %v846_v62, %v2699_v22  ;;  %v856_v8 = vmul.f32 %v846_v62, %v2711_v35  ;;  %v857_v36 = vmul.f32 %v846_v62, %v2715_v42 }
 0x333   :  { %v858_v2 = vmul.f32 %v846_v62, %v2727_v23  ;;  %v859_v1 = vmul.f32 %v846_v62, %v2731_v11 }
 0x33b   :  { %v841_v21 = vpop.permute.xlu1 %840 }
 0x33c   :  { %v848_v41 = vmul.f32 %v841_v21, %v2677_v3  ;;  %v849_v34 = vmul.f32 %v841_v21, %v2679_v4  ;;  %v850_v16 = vmul.f32 %v841_v21, %v2687_v37  ;;  %v851_v40 = vmul.f32 %v841_v21, %v2695_v14 }
 0x33d   :  { %v852_v45 = vmul.f32 %v841_v21, %v2703_v26  ;;  %v853_v46 = vmul.f32 %v841_v21, %v2721_v48 }
 0x33f   :  { %v863_v29 = vpop.permute.xlu0 %862 }
 0x340   :  { %v870_v25 = vadd.f32 %v863_v29, %v848_v41  ;;  %v871_v49 = vadd.f32 %v863_v29, %v849_v34  ;;  %v872_v50 = vadd.f32 %v863_v29, %v850_v16  ;;  %v873_v47 = vadd.f32 %v863_v29, %v851_v40 }
 0x341   :  { %v874_v52 = vadd.f32 %v863_v29, %v852_v45  ;;  %v875_v53 = vadd.f32 %v863_v29, %v853_v46 }
 0x342   :  { %v882_v54 = vmax.f32 %v870_v25, 0.0  ;;  %v883_v28 = vmax.f32 %v871_v49, 0.0  ;;  %v884_v3 = vmax.f32 %v872_v50, 0.0  ;;  %v885_v44 = vmax.f32 %v873_v47, 0.0 }
 0x343   :  { %v886_v4 = vmax.f32 %v874_v52, 0.0  ;;  %v887_v55 = vmax.f32 %v875_v53, 0.0 }
 0x344   :  { %v894_v37 = vmul.f32 %v882_v54, %v2675_v61  ;;  %v895_v14 = vmul.f32 %v883_v28, %v2681_v5  ;;  %v896_v26 = vmul.f32 %v884_v3, %v2689_v10  ;;  %v897_v48 = vmul.f32 %v885_v44, %v2691_v13 }
 0x345   :  { %v898_v57 = vmul.f32 %v886_v4, %v2705_v27  ;;  %v899_v58 = vmul.f32 %v887_v55, %v2717_v43 }
 0x346   :  { %v910_v59 = vpack.c.bf16 %v895_v14, %v894_v37  ;;  %v911_v60 = vpack.c.bf16 %v897_v48, %v896_v26 }
 0x347   :  { %v912_v51 = vpack.c.bf16 %v899_v58, %v898_v57 }
 0x348   :  { %916 = vst [vmem:[#allocation2 + $0x4] sm:$0xff] %v910_v59 }
 0x349   :  { %917 = vst [vmem:[#allocation2 + $0xc] sm:$0xff] %v911_v60 }
 0x34a   :  { %918 = vst [vmem:[#allocation2 + $0x14] sm:$0xff] %v912_v51 }
 0x34d   :  { %v868_v12 = vpop.permute.xlu1 %867 }
 0x34e   :  { %v876_v15 = vadd.f32 %v868_v12, %v854_v6  ;;  %v877_v9 = vadd.f32 %v868_v12, %v855_v56  ;;  %v878_v17 = vadd.f32 %v868_v12, %v856_v8  ;;  %v879_v18 = vadd.f32 %v868_v12, %v857_v36 }
 0x34f   :  { %v880_v0 = vadd.f32 %v868_v12, %v858_v2  ;;  %v881_v7 = vadd.f32 %v868_v12, %v859_v1  ;;  %v1935_v25 = vld [vmem:[#allocation2 + $0x4] sm:$0xf]  ;;  %v2008_v50 = vld [vmem:[#allocation2 + $0x8] sm:$0xf] }
 0x350   :  { %v888_v24 = vmax.f32 %v876_v15, 0.0  ;;  %v889_v21 = vmax.f32 %v877_v9, 0.0  ;;  %v890_v19 = vmax.f32 %v878_v17, 0.0  ;;  %v891_v41 = vmax.f32 %v879_v18, 0.0  ;;  %v2002_v28 = vld [vmem:[#allocation2 + $0x8] sm:$0xf] }
 0x351   :  { %v892_v22 = vmax.f32 %v880_v0, 0.0  ;;  %v893_v34 = vmax.f32 %v881_v7, 0.0  ;;  %v1995_v55 = vld [vmem:[#allocation2 + $0x4] sm:$0xf]  ;;  %v1943_v37 = vld [vmem:[#allocation2 + $0xc] sm:$0xf] }
 0x352   :  { %v900_v35 = vmul.f32 %v888_v24, %v2675_v61  ;;  %v901_v42 = vmul.f32 %v889_v21, %v2681_v5  ;;  %v902_v23 = vmul.f32 %v890_v19, %v2689_v10  ;;  %v903_v11 = vmul.f32 %v891_v41, %v2691_v13  ;;  %v1911_v58 = vld [vmem:[#allocation2 + $0x4] sm:$0xf]  ;;  %v2009_v59 = vld [vmem:[#allocation2 + $0x10] sm:$0xf]  ;;  %v1891_v6 = vld [vmem:[#allocation2 + $0x8] sm:$0xf] }
 0x353   :  { %v904_v16 = vmul.f32 %v892_v22, %v2705_v27  ;;  %v905_v40 = vmul.f32 %v893_v34, %v2717_v43  ;;  %v1996_v2 = vld [vmem:[#allocation2 + $0xc] sm:$0xf]  ;;  %v1951_v0 = vld [vmem:[#allocation2 + $0x14] sm:$0xf]  ;;  %v1899_v7 = vld [vmem:[#allocation2 + $0x10] sm:$0xf] }
 0x354   :  { %v913_v45 = vpack.c.bf16 %v901_v42, %v900_v35  ;;  %v914_v46 = vpack.c.bf16 %v903_v11, %v902_v23  ;;  %v1919_v1 = vld [vmem:[#allocation2 + $0xc] sm:$0xf]  ;;  %v2003_v24 = vld [vmem:[#allocation2 + $0x10] sm:$0xf]  ;;  %v2010_v35 = vld [vmem:[#allocation2 + $0x18] sm:$0xf] }
 0x355   :  { %v915_v29 = vpack.c.bf16 %v905_v40, %v904_v16  ;;  %v1927_v42 = vld [vmem:[#allocation2 + $0x14] sm:$0xf] }
 0x356   :  { %919 = vst [vmem:[#allocation2 + $0x24] sm:$0xff] %v913_v45  ;;  %v1907_v45 = vld [vmem:[#allocation2 + $0x18] sm:$0xf] }
 0x357   :  { %920 = vst [vmem:[#allocation2 + $0x2c] sm:$0xff] %v914_v46 }
 0x358   :  { %921 = vst [vmem:[#allocation2 + $0x34] sm:$0xff] %v915_v29 }
 0x35d   :  { %v2011_v49 = vld [vmem:[#allocation2 + $0x20] sm:$0xf0]  ;;  %v1937_v47 = vld [vmem:[#allocation2 + $0x24] sm:$0xf0] }
 0x35e   :  { %v1936_v52 = vor.u32 %v2011_v49, %v1935_v25  ;;  %v1940_v53 = vor.u32 %v2008_v50, %v1937_v47  ;;  %v1913_v54 = vld [vmem:[#allocation2 + $0x24] sm:$0xf0]  ;;  %v1885_v44 = vld [vmem:[#allocation2 + $0x20] sm:$0xf0]  ;;  %v2012_v4 = vld [vmem:[#allocation2 + $0x28] sm:$0xf0] }
 0x35f   :  { %v1916_v3 = vor.u32 %v2002_v28, %v1913_v54  ;;  %v2793_v14 = vor.u32 %v1995_v55, %v1885_v44  ;;  %v1944_v26 = vor.u32 %v2012_v4, %v1943_v37  ;;  %v2005_v48 = vld [vmem:[#allocation2 + $0x20] sm:$0xf0]  ;;  %v1945_v57 = vld [vmem:[#allocation2 + $0x2c] sm:$0xf0]  ;;  %v1999_v62 = vld [vmem:[#allocation2 + $0x24] sm:$0xf0] }
 0x360   :  { %1143 = vrot.lane.b32.xlu2 %v1936_v52, %s2034_s21  ;;  %1105 = vrot.lane.b32.xlu0 %v1940_v53, %s2036_s11  ;;  %v1912_v60 = vor.u32 %v2005_v48, %v1911_v58  ;;  %v2799_v51 = vor.u32 %v2009_v59, %v1945_v57  ;;  %v1892_v56 = vor.u32 %v1999_v62, %v1891_v6  ;;  %v1893_v8 = vld [vmem:[#allocation2 + $0x28] sm:$0xf0]  ;;  %v2013_v9 = vld [vmem:[#allocation2 + $0x30] sm:$0xf0]  ;;  %v2000_v17 = vld [vmem:[#allocation2 + $0x2c] sm:$0xf0] }
 0x361   :  { %1145 = vrot.lane.b32.xlu1 %v1940_v53, %s2034_s21  ;;  %v2006_v36 = vld [vmem:[#allocation2 + $0x28] sm:$0xf0]  ;;  %v1896_v12 = vor.u32 %v1996_v2, %v1893_v8  ;;  %v1921_v18 = vld [vmem:[#allocation2 + $0x2c] sm:$0xf0]  ;;  %v1952_v21 = vor.u32 %v2013_v9, %v1951_v0  ;;  %v2821_v19 = vor.u32 %v2000_v17, %v1899_v7  ;;  %v1953_v22 = vld [vmem:[#allocation2 + $0x34] sm:$0xf0] }
 0x362   :  { %v1920_v15 = vor.u32 %v2006_v36, %v1919_v1  ;;  %v1924_v41 = vor.u32 %v2003_v24, %v1921_v18  ;;  %v2007_v34 = vld [vmem:[#allocation2 + $0x30] sm:$0xf0]  ;;  %v1956_v23 = vor.u32 %v2010_v35, %v1953_v22  ;;  %v2001_v40 = vld [vmem:[#allocation2 + $0x34] sm:$0xf0] }
 0x363   :  { %v1928_v11 = vor.u32 %v2007_v34, %v1927_v42  ;;  %v2837_v46 = vor.u32 %v2001_v40, %v1907_v45  ;;  %v1901_v25 = vld [vmem:[#allocation2 + $0x30] sm:$0xf0] }
 0x364   :  { %v1997_v49 = vld [vmem:[#allocation2 + $0x14] sm:$0xf] }
 0x365   :  { %v2844_v50 = vor.u32 %v1997_v49, %v1901_v25 }
 0x368   :  { %1123 = vrot.lane.b32.xlu2 %v1936_v52, %s2035_s22  ;;  %1059 = vrot.lane.b32.xlu0 %v1916_v3, %s2037_s26 }
 0x369   :  { %1125 = vrot.lane.b32.xlu1 %v1940_v53, %s2035_s22 }
 0x370   :  { %1103 = vrot.lane.b32.xlu2 %v1936_v52, %s2036_s11  ;;  %1015 = vrot.lane.b32.xlu0 %v2793_v14, %s2039_s28 }
 0x371   :  { %1147 = vrot.lane.b32.xlu1 %v1944_v26, %s2034_s21 }
 0x378   :  { %1057 = vrot.lane.b32.xlu2 %v1912_v60, %s2037_s26  ;;  %1149 = vrot.lane.b32.xlu0 %v2799_v51, %s2034_s21 }
 0x379   :  { %1127 = vrot.lane.b32.xlu1 %v1944_v26, %s2035_s22 }
 0x380   :  { %1107 = vrot.lane.b32.xlu2 %v1944_v26, %s2036_s11  ;;  %997 = vrot.lane.b32.xlu0 %v1892_v56, %s2040_s19 }
 0x381   :  { %1017 = vrot.lane.b32.xlu1 %v1892_v56, %s2039_s28 }
 0x388   :  { %995 = vrot.lane.b32.xlu2 %v2793_v14, %s2040_s19  ;;  %1019 = vrot.lane.b32.xlu0 %v1896_v12, %s2039_s28 }
 0x389   :  { %1061 = vrot.lane.b32.xlu1 %v1920_v15, %s2037_s26 }
 0x390   :  { %1129 = vrot.lane.b32.xlu2 %v2799_v51, %s2035_s22  ;;  %999 = vrot.lane.b32.xlu0 %v1896_v12, %s2040_s19 }
 0x391   :  { %975 = vrot.lane.b32.xlu1 %v2793_v14, %s2041_s27 }
 0x398   :  { %977 = vrot.lane.b32.xlu2 %v1892_v56, %s2041_s27  ;;  %1163 = vrot.lane.b32.xlu0 %v1936_v52, %s2038_s12  ;;  %v1929_v52 = vld [vmem:[#allocation2 + $0x34] sm:$0xf0] }
 0x399   :  { %1109 = vrot.lane.b32.xlu1 %v2799_v51, %s2036_s11 }
 0x3a0   :  { %1151 = vrot.lane.b32.xlu2 %v1952_v21, %s2034_s21  ;;  %1021 = vrot.lane.b32.xlu0 %v2821_v19, %s2039_s28 }
 0x3a1   :  { %1063 = vrot.lane.b32.xlu1 %v1924_v41, %s2037_s26 }
 0x3a8   :  { %1131 = vrot.lane.b32.xlu2 %v1952_v21, %s2035_s22  ;;  %1001 = vrot.lane.b32.xlu0 %v2821_v19, %s2040_s19 }
 0x3a9   :  { %1165 = vrot.lane.b32.xlu1 %v1940_v53, %s2038_s12  ;;  %v2004_v53 = vld [vmem:[#allocation2 + $0x18] sm:$0xf] }
 0x3aa   :  { %v1932_v54 = vor.u32 %v2004_v53, %v1929_v52 }
 0x3b0   :  { %979 = vrot.lane.b32.xlu2 %v1896_v12, %s2041_s27  ;;  %1167 = vrot.lane.b32.xlu0 %v1944_v26, %s2038_s12 }
 0x3b1   :  { %1111 = vrot.lane.b32.xlu1 %v1952_v21, %s2036_s11 }
 0x3b8   :  { %1153 = vrot.lane.b32.xlu2 %v1956_v23, %s2034_s21  ;;  %1113 = vrot.lane.b32.xlu0 %v1956_v23, %s2036_s11 }
 0x3b9   :  { %1065 = vrot.lane.b32.xlu1 %v1928_v11, %s2037_s26 }
 0x3ba   :  { %v1144_v16 = vpop.permute.xlu2 %1143 }
 0x3c0   :  { %1133 = vrot.lane.b32.xlu2 %v1956_v23, %s2035_s22  ;;  %985 = vrot.lane.b32.xlu0 %v2837_v46, %s2041_s27 }
 0x3c1   :  { %981 = vrot.lane.b32.xlu1 %v2821_v19, %s2041_s27 }
 0x3c2   :  { %v1124_v29 = vpop.permute.xlu2 %1123 }
 0x3c8   :  { %1023 = vrot.lane.b32.xlu2 %v2844_v50, %s2039_s28  ;;  %1194 = vrot.lane.b32.xlu0 %v1892_v56, %s2042_s0 }
 0x3c9   :  { %1003 = vrot.lane.b32.xlu1 %v2844_v50, %s2040_s19 }
 0x3ca   :  { %v1104_v47 = vpop.permute.xlu2 %1103 }
 0x3d0   :  { %1067 = vrot.lane.b32.xlu2 %v1932_v54, %s2037_s26  ;;  %1196 = vrot.lane.b32.xlu0 %v1896_v12, %s2042_s0 }
 0x3d1   :  { %1169 = vrot.lane.b32.xlu1 %v2799_v51, %s2038_s12 }
 0x3d2   :  { %v1106_v28 = vpop.permute.xlu0 %1105  ;;  %v1058_v3 = vpop.permute.xlu2 %1057 }
 0x3d3   :  { %v1146_v44 = vpop.permute.xlu1 %1145  ;;  %v1117_v0 = vsel %vm238_vm2, %v1104_v47, %v1106_v28 }
 0x3d4   :  { %v1157_v7 = vsel %vm280_vm0, %v1144_v16, %v1146_v44 }
 0x3d8   :  { %1025 = vrot.lane.b32.xlu2 %v2837_v46, %s2039_s28  ;;  %1246 = vrot.lane.b32.xlu0 %v1058_v3, %s2042_s0 }
 0x3d9   :  { %983 = vrot.lane.b32.xlu1 %v2844_v50, %s2041_s27 }
 0x3da   :  { %v2860_v4 = vpop.permute.xlu2 %1107  ;;  %v1060_v55 = vpop.permute.xlu0 %1059 }
 0x3db   :  { %v1118_v37 = vsel %vm238_vm2, %v1106_v28, %v2860_v4  ;;  %v1069_v26 = vsel %vm189_vm3, %v1058_v3, %v1060_v55  ;;  %v1126_v48 = vpop.permute.xlu1 %1125 }
 0x3dc   :  { %v1137_v22 = vsel %vm259_vm1, %v1124_v29, %v1126_v48 }
 0x3e0   :  { %1171 = vrot.lane.b32.xlu2 %v1952_v21, %s2038_s12 }
 0x3e1   :  { %1005 = vrot.lane.b32.xlu1 %v2837_v46, %s2040_s19 }
 0x3e2   :  { %v996_v57 = vpop.permute.xlu2 %995  ;;  %v1016_v58 = vpop.permute.xlu0 %1015 }
 0x3e3   :  { %v2874_v51 = vpop.permute.xlu1 %1147  ;;  %v1007_v53 = vsel %vm125_vm6, %v2737_v31, %v996_v57 }
 0x3e4   :  { %v1158_v11 = vsel %vm280_vm0, %v1146_v44, %v2874_v51  ;;  %v1027_v44 = vsel %vm146_vm5, %v2749_v39, %v1016_v58 }
 0x3e8   :  { %1173 = vrot.lane.b32.xlu2 %v1956_v23, %s2038_s12 }
 0x3e9   :  { %1260 = vrot.lane.b32.xlu1 %v1104_v47, %s2042_s0 }
 0x3ea   :  { %v2870_v59 = vpop.permute.xlu2 %1129  ;;  %v2872_v60 = vpop.permute.xlu0 %1149 }
 0x3eb   :  { %v1128_v8 = vpop.permute.xlu1 %1127  ;;  %v1159_v39 = vsel %vm280_vm0, %v2874_v51, %v2872_v60 }
 0x3ec   :  { %v1138_v41 = vsel %vm259_vm1, %v1126_v48, %v1128_v8  ;;  %v1139_v31 = vsel %vm259_vm1, %v1128_v8, %v2870_v59 }
 0x3f0   :  { %1192 = vrot.lane.b32.xlu2 %v2793_v14, %s2042_s0 }
 0x3f2   :  { %v2878_v62 = vpop.permute.xlu2 %977  ;;  %v998_v6 = vpop.permute.xlu0 %997 }
 0x3f3   :  { %v2881_v56 = vsel %vm125_vm6, %v996_v57, %v998_v6  ;;  %v1018_v1 = vpop.permute.xlu1 %1017 }
 0x3f4   :  { %v1028_v23 = vsel %vm146_vm5, %v1016_v58, %v1018_v1 }
 0x3f8   :  { %1198 = vrot.lane.b32.xlu2 %v2821_v19, %s2042_s0 }
 0x3fa   :  { %v2885_v36 = vpop.permute.xlu2 %1151  ;;  %v2887_v2 = vpop.permute.xlu0 %1019 }
 0x3fb   :  { %v2899_v9 = vpop.permute.xlu1 %1061  ;;  %v1160_v3 = vsel %vm280_vm0, %v2872_v60, %v2885_v36  ;;  %v1029_v57 = vsel %vm146_vm5, %v1018_v1, %v2887_v2 }
 0x3fc   :  { %v1070_v45 = vsel %vm189_vm3, %v1060_v55, %v2899_v9 }
 0x400   :  { %1288 = vrot.lane.b32.xlu2 %v1144_v16, %s2042_s0 }
 0x402   :  { %v2890_v12 = vpop.permute.xlu2 %1131  ;;  %v2892_v14 = vpop.permute.xlu0 %999 }
 0x403   :  { %v2896_v15 = vsel %vm125_vm6, %v998_v6, %v2892_v14  ;;  %v976_v19 = vpop.permute.xlu1 %975 }
 0x404   :  { %v988_v47 = vsel %vm104_vm7, %v976_v19, %v2878_v62 }
 0x408   :  { %1274 = vrot.lane.b32.xlu2 %v1124_v29, %s2042_s0 }
 0x40a   :  { %v2901_v17 = vpop.permute.xlu2 %979  ;;  %v2903_v18 = vpop.permute.xlu0 %1163 }
 0x40b   :  { %1302 = vrot.lane.b32.xlu0 %v2903_v18, %s2042_s0  ;;  %v2923_v42 = vpop.permute.xlu1 %1109  ;;  %v989_v51 = vsel %vm104_vm7, %v2878_v62, %v2901_v17  ;;  %v987_v62 = vsel %vm104_vm7, %v2735_v32, %v976_v19 }
 0x410   :  { %1262 = vrot.lane.b32.xlu2 %v1117_v0, %s2042_s0 }
 0x412   :  { %v2910_v24 = vpop.permute.xlu2 %1153  ;;  %v2912_v21 = vpop.permute.xlu0 %1021 }
 0x413   :  { %1290 = vrot.lane.b32.xlu0 %v1157_v7, %s2042_s0  ;;  %v1064_v29 = vpop.permute.xlu1 %1063  ;;  %v1161_v7 = vsel %vm280_vm0, %v2885_v36, %v2910_v24 }
 0x418   :  { %1278 = vrot.lane.b32.xlu2 %v1138_v41, %s2042_s0 }
 0x41a   :  { %v2918_v34 = vpop.permute.xlu2 %1133  ;;  %v2920_v35 = vpop.permute.xlu0 %1001 }
 0x41b   :  { %1276 = vrot.lane.b32.xlu0 %v1137_v22, %s2042_s0  ;;  %v2947_v52 = vpop.permute.xlu1 %1165  ;;  %v1141_v32 = vsel %vm259_vm1, %v2890_v12, %v2918_v34 }
 0x420   :  { %1234 = vrot.lane.b32.xlu2 %v1028_v23, %s2042_s0  ;;  %v1119_v23 = vsel %vm238_vm2, %v2860_v4, %v2923_v42 }
 0x422   :  { %v2929_v16 = vpop.permute.xlu2 %1023  ;;  %v2931_v40 = vpop.permute.xlu0 %1167 }
 0x423   :  { %1292 = vrot.lane.b32.xlu0 %v1158_v11, %s2042_s0  ;;  %v2967_v48 = vpop.permute.xlu1 %1111  ;;  %v1071_v11 = vsel %vm189_vm3, %v2899_v9, %v1064_v29  ;;  %v1031_v4 = vsel %vm146_vm5, %v2912_v21, %v2929_v16  ;;  %v1177_v9 = vsel %vm301_vm4, %v2903_v18, %v2947_v52 }
 0x428   :  { %1250 = vrot.lane.b32.xlu2 %v1070_v45, %s2042_s0 }
 0x42a   :  { %v2937_v25 = vpop.permute.xlu2 %1067  ;;  %v2939_v49 = vpop.permute.xlu0 %1113 }
 0x42b   :  { %1258 = vrot.lane.b32.xlu1 %v2937_v25, %s2042_s0  ;;  %1264 = vrot.lane.b32.xlu0 %v1118_v37, %s2042_s0  ;;  %v1066_v60 = vpop.permute.xlu1 %1065 }
 0x430   :  { %1206 = vrot.lane.b32.xlu2 %v988_v47, %s2042_s0  ;;  %v1162_v47 = vsel %vm280_vm0, %v2910_v24, %v2741_v38  ;;  %v1120_v38 = vsel %vm238_vm2, %v2923_v42, %v2967_v48 }
 0x432   :  { %v2951_v54 = vpop.permute.xlu2 %1025  ;;  %v2953_v28 = vpop.permute.xlu0 %985 }
 0x433   :  { %1248 = vrot.lane.b32.xlu1 %v1069_v26, %s2042_s0  ;;  %1218 = vrot.lane.b32.xlu0 %v1007_v53, %s2042_s0  ;;  %v1140_v26 = vsel %vm259_vm1, %v2870_v59, %v2890_v12  ;;  %v982_v41 = vpop.permute.xlu1 %981  ;;  %v1032_v18 = vsel %vm146_vm5, %v2929_v16, %v2951_v54 }
 0x434   :  { %v990_v19 = vsel %vm104_vm7, %v2901_v17, %v982_v41  ;;  %v1142_v17 = vsel %vm259_vm1, %v2918_v34, %v2739_v30 }
 0x438   :  { %1296 = vrot.lane.b32.xlu2 %v1160_v3, %s2042_s0 }
 0x43a   :  { %v2965_v55 = vpop.permute.xlu2 %1171  ;;  %v1195_v37 = vpop.permute.xlu0 %1194 }
 0x43b   :  { %1232 = vrot.lane.b32.xlu1 %v1027_v44, %s2042_s0  ;;  %1280 = vrot.lane.b32.xlu0 %v1139_v31, %s2042_s0  ;;  %v1004_v36 = vpop.permute.xlu1 %1003  ;;  %v1178_v31 = vsel %vm301_vm4, %v2947_v52, %v2931_v40 }
 0x440   :  { %1282 = vrot.lane.b32.xlu2 %v1140_v26, %s2042_s0 }
 0x442   :  { %v2980_v58 = vpop.permute.xlu2 %1173  ;;  %v2982_v6 = vpop.permute.xlu0 %1196 }
 0x443   :  { %v2987_v8 = vsel %vm301_vm4, %v2965_v55, %v2980_v58  ;;  %1294 = vrot.lane.b32.xlu1 %v1159_v39, %s2042_s0  ;;  %1236 = vrot.lane.b32.xlu0 %v1029_v57, %s2042_s0  ;;  %v2993_v59 = vsel %vm445_vm8, %v1195_v37, %v2982_v6  ;;  %v1170_v45 = vpop.permute.xlu1 %1169 }
 0x444   :  { %v1180_v44 = vsel %vm301_vm4, %v1170_v45, %v2965_v55  ;;  %v1121_v55 = vsel %vm238_vm2, %v2967_v48, %v2939_v49 }
 0x448   :  { %1208 = vrot.lane.b32.xlu2 %v989_v51, %s2042_s0 }
 0x44a   :  { %v2999_v1 = vpop.permute.xlu2 %1192  ;;  %v1247_v30 = vpop.permute.xlu0 %1246 }
 0x44b   :  { %1220 = vrot.lane.b32.xlu1 %v2881_v56, %s2042_s0  ;;  %1222 = vrot.lane.b32.xlu0 %v2896_v15, %s2042_s0  ;;  %v3007_v0 = vsel %vm445_vm8, %v2999_v1, %v1195_v37  ;;  %v1030_v56 = vsel %vm146_vm5, %v2887_v2, %v2912_v21  ;;  %v1072_v15 = vsel %vm189_vm3, %v1064_v29, %v1066_v60  ;;  %v984_v21 = vpop.permute.xlu1 %983 }
 0x44c   :  { %v1073_v29 = vsel %vm189_vm3, %v1066_v60, %v2937_v25  ;;  %v991_v24 = vsel %vm104_vm7, %v982_v41, %v984_v21  ;;  %v1010_v25 = vsel %vm125_vm6, %v2892_v14, %v2920_v35  ;;  %v992_v14 = vsel %vm104_vm7, %v984_v21, %v2953_v28 }
 0x44d   :  { %vm1680_vm3 = vcmask 1043456  }
 0x450   :  { %1298 = vrot.lane.b32.xlu2 %v1161_v7, %s2042_s0 }
 0x452   :  { %v3018_v22 = vpop.permute.xlu2 %1198 }
 0x453   :  { %1204 = vrot.lane.b32.xlu1 %v987_v62, %s2042_s0  ;;  %1238 = vrot.lane.b32.xlu0 %v1030_v56, %s2042_s0  ;;  %v1006_v34 = vpop.permute.xlu1 %1005 }
 0x454   :  { %v1012_v42 = vsel %vm125_vm6, %v1004_v36, %v1006_v34 }
 0x458   :  { %1254 = vrot.lane.b32.xlu2 %v1072_v15, %s2042_s0 }
 0x45a   :  { %v1289_v2 = vpop.permute.xlu2 %1288 }
 0x45b   :  { %1266 = vrot.lane.b32.xlu1 %v1119_v23, %s2042_s0  ;;  %1284 = vrot.lane.b32.xlu0 %v1141_v32, %s2042_s0  ;;  %v1261_v51 = vpop.permute.xlu1 %1260 }
 0x460   :  { %1210 = vrot.lane.b32.xlu2 %v990_v19, %s2042_s0 }
 0x462   :  { %v1275_v12 = vpop.permute.xlu2 %1274 }
 0x463   :  { %1252 = vrot.lane.b32.xlu1 %v1071_v11, %s2042_s0  ;;  %1240 = vrot.lane.b32.xlu0 %v1031_v4, %s2042_s0 }
 0x468   :  { %1300 = vrot.lane.b32.xlu2 %v1162_v47, %s2042_s0 }
 0x46a   :  { %v1263_v53 = vpop.permute.xlu2 %1262 }
 0x46b   :  { %1304 = vrot.lane.b32.xlu1 %v1177_v9, %s2042_s0  ;;  %1286 = vrot.lane.b32.xlu0 %v1142_v17, %s2042_s0  ;;  %v1346_v48 = vsel %vm445_vm8, %v1261_v51, %v1263_v53  ;;  %v1182_v17 = vsel %vm301_vm4, %v2980_v58, %v2747_v63  ;;  %v1316_v63 = vsel %vm445_vm8, %v2745_v20, %v2999_v1  ;;  %v1183_v20 = vld [vmem:[%s3314_s4] sm:$0xff] }
 0x46c   :  { %v1185_v1 = vunpack.c.l.b16 %v1183_v20 }
 0x470   :  { %1256 = vrot.lane.b32.xlu2 %v1073_v29, %s2042_s0 }
 0x472   :  { %v3071_v3 = vpop.permute.xlu2 %1278 }
 0x473   :  { %1268 = vrot.lane.b32.xlu1 %v1120_v38, %s2042_s0  ;;  %1242 = vrot.lane.b32.xlu0 %v1032_v18, %s2042_s0 }
 0x478   :  { %1212 = vrot.lane.b32.xlu2 %v991_v24, %s2042_s0 }
 0x47a   :  { %v1235_v37 = vpop.permute.xlu2 %1234 }
 0x47b   :  { %1228 = vrot.lane.b32.xlu0 %v1012_v42, %s2042_s0  ;;  %1224 = vrot.lane.b32.xlu1 %v1010_v25, %s2042_s0 }
 0x47d   :  { %v3075_v16 = vpop.permute.xlu0 %1302 }
 0x480   :  { %1310 = vrot.lane.b32.xlu2 %v1180_v44, %s2042_s0 }
 0x482   :  { %v3095_v57 = vpop.permute.xlu2 %1250 }
 0x483   :  { %1306 = vrot.lane.b32.xlu1 %v1178_v31, %s2042_s0  ;;  %1214 = vrot.lane.b32.xlu0 %v992_v14, %s2042_s0 }
 0x485   :  { %v1291_v26 = vpop.permute.xlu0 %1290 }
 0x486   :  { %v1358_v39 = vsel %vm445_vm8, %v1289_v2, %v1291_v26 }
 0x487   :  { %1427 = vmatpush.bf16.msrb.mxu3 %v1358_v39 }
 0x488   :  { %1200 = vrot.lane.b32.xlu2 %v2844_v50, %s2042_s0  ;;  %v1011_v50 = vsel %vm125_vm6, %v2920_v35, %v1004_v36  ;;  %v1122_v36 = vsel %vm238_vm2, %v2939_v49, %v2743_v33 }
 0x48a   :  { %v1207_v62 = vpop.permute.xlu2 %1206 }
 0x48b   :  { %1270 = vrot.lane.b32.xlu1 %v1121_v55, %s2042_s0  ;;  %1230 = vrot.lane.b32.xlu0 %v1006_v34, %s2042_s0  ;;  %v3167_v55 = vpack.c.b16 %v1185_v1, %v1185_v1 }
 0x48d   :  { %v1277_v52 = vpop.permute.xlu0 %1276 }
 0x48e   :  { %v1352_v60 = vsel %vm445_vm8, %v1275_v12, %v1277_v52  ;;  %v1353_v35 = vsel %vm445_vm8, %v1277_v52, %v3071_v3 }
 0x48f   :  { %1428 = vmatpush.bf16.msrb.mxu3 %v1352_v60 }
 0x490   :  { %1216 = vrot.lane.b32.xlu2 %v2953_v28, %s2042_s0  ;;  %v1179_v28 = vsel %vm301_vm4, %v2931_v40, %v1170_v45  ;;  %vm1676_vm4 = vcmask 64512  }
 0x492   :  { %v3121_v23 = vpop.permute.xlu2 %1296 }
 0x493   :  { %1226 = vrot.lane.b32.xlu1 %v1011_v50, %s2042_s0  ;;  %1202 = vrot.lane.b32.xlu0 %v2837_v46, %s2042_s0 }
 0x494   :  { %1429 = vmatpush.bf16.msrb.mxu3 %v1346_v48 }
 0x495   :  { %v1293_v7 = vpop.permute.xlu0 %1292 }
 0x496   :  { %v1359_v41 = vsel %vm445_vm8, %v1291_v26, %v1293_v7 }
 0x497   :  { %1453 = vmatpush.bf16.msra.mxu1 %v1359_v41 }
 0x49a   :  { %v3129_v11 = vpop.permute.xlu2 %1282 }
 0x49b   :  { %1308 = vrot.lane.b32.xlu1 %v1179_v28, %s2042_s0  ;;  %1454 = vmatpush.bf16.msra.mxu1 %v1353_v35 }
 0x49d   :  { %v3112_v56 = vpop.permute.xlu1 %1258  ;;  %v3114_v46 = vpop.permute.xlu0 %1264 }
 0x49e   :  { %v1347_v15 = vsel %vm445_vm8, %v1263_v53, %v3114_v46 }
 0x49f   :  { %1455 = vmatpush.bf16.msra.mxu1 %v1347_v15 }
 0x4a2   :  { %v1209_v38 = vpop.permute.xlu2 %1208 }
 0x4a3   :  { %1272 = vrot.lane.b32.xlu1 %v1122_v36, %s2042_s0  ;;  %v1323_v18 = vsel %vm445_vm8, %v1207_v62, %v1209_v38 }
 0x4a5   :  { %v1249_v40 = vpop.permute.xlu1 %1248  ;;  %v1219_v32 = vpop.permute.xlu0 %1218 }
 0x4a6   :  { %v1340_v2 = vsel %vm445_vm8, %v1247_v30, %v1249_v40  ;;  %v1341_v19 = vsel %vm445_vm8, %v1249_v40, %v3095_v57 }
 0x4a7   :  { %1430 = vmatpush.bf16.msrb.mxu3 %v1340_v2  ;;  %1456 = vmatpush.bf16.msra.mxu1 %v1341_v19 }
 0x4aa   :  { %v3153_v34 = vpop.permute.xlu2 %1298 }
 0x4ab   :  { %1244 = vrot.lane.b32.xlu1 %v2951_v54, %s2042_s0 }
 0x4ad   :  { %v1233_v4 = vpop.permute.xlu1 %1232  ;;  %v1281_v33 = vpop.permute.xlu0 %1280 }
 0x4ae   :  { %v1334_v49 = vsel %vm445_vm8, %v1233_v4, %v1235_v37  ;;  %v3134_v45 = vsel %vm445_vm8, %v1281_v33, %v3129_v11  ;;  %v1354_v39 = vsel %vm445_vm8, %v3071_v3, %v1281_v33 }
 0x4af   :  { %1431 = vmatpush.bf16.msrb.mxu3 %v1334_v49 }
 0x4b2   :  { %v3155_v44 = vpop.permute.xlu2 %1254 }
 0x4b3   :  { %1312 = vrot.lane.b32.xlu1 %v2987_v8, %s2042_s0 }
 0x4b5   :  { %v1295_v12 = vpop.permute.xlu1 %1294  ;;  %v1237_v47 = vpop.permute.xlu0 %1236 }
 0x4b6   :  { %v1361_v9 = vsel %vm445_vm8, %v1295_v12, %v3121_v23  ;;  %v1335_v54 = vsel %vm445_vm8, %v1235_v37, %v1237_v47  ;;  %v1360_v37 = vsel %vm445_vm8, %v1293_v7, %v1295_v12 }
 0x4b7   :  { %1457 = vmatpush.bf16.msra.mxu1 %v1335_v54  ;;  %v1362_v54 = vsel %vm445_vm8, %v3121_v23, %v3153_v34  ;;  %v1319_v23 = vsel %vm445_vm8, %v2982_v6, %v3018_v22 }
 0x4bb   :  { %1314 = vrot.lane.b32.xlu1 %v1182_v17, %s2042_s0 }
 0x4bd   :  { %v1221_v21 = vpop.permute.xlu1 %1220  ;;  %v1223_v29 = vpop.permute.xlu0 %1222 }
 0x4be   :  { %v1328_v53 = vsel %vm445_vm8, %v1219_v32, %v1221_v21  ;;  %v1329_v8 = vsel %vm445_vm8, %v1221_v21, %v1223_v29 }
 0x4bf   :  { %1432 = vmatpush.bf16.msrb.mxu3 %v1328_v53  ;;  %1458 = vmatpush.bf16.msra.mxu1 %v1329_v8 }
 0x4c3   :  { %1459 = vmatpush.bf16.msra.mxu1 %v1323_v18 }
 0x4c5   :  { %v1205_v30 = vpop.permute.xlu1 %1204  ;;  %v1239_v42 = vpop.permute.xlu0 %1238 }
 0x4c6   :  { %v1322_v24 = vsel %vm445_vm8, %v1205_v30, %v1207_v62  ;;  %v1336_v41 = vsel %vm445_vm8, %v1237_v47, %v1239_v42 }
 0x4c7   :  { %1433 = vmatpush.bf16.msrb.mxu3 %v1322_v24  ;;  %1460 = vmatpush.bf16.msra.mxu1 %v3007_v0  ;;  %v1186_v0 = vunpack.c.h.b16 %v1183_v20 }
 0x4c9   :  { %v3169_v52 = vpack.c.b16 %v1186_v0, %v1186_v0 }
 0x4ca   :  { %1461 = vmatmul.bf16.vlgmr.msra.gmra.mxu1 %v3167_v55 }
 0x4cb   :  { %1434 = vmatpush.bf16.msrb.mxu3 %v1316_v63 }
 0x4cd   :  { %v1267_v58 = vpop.permute.xlu1 %1266  ;;  %v3163_v26 = vpop.permute.xlu0 %1284 }
 0x4ce   :  { %1435 = vmatmul.bf16.vlgmr.msrb.gmra.mxu3 %v3167_v55  ;;  %v1348_v50 = vsel %vm445_vm8, %v3114_v46, %v1267_v58 }
 0x4d5   :  { %v1253_v25 = vpop.permute.xlu1 %1252  ;;  %v3181_v51 = vpop.permute.xlu0 %1240 }
 0x4d6   :  { %v1342_v3 = vsel %vm445_vm8, %v3095_v57, %v1253_v25  ;;  %v1343_v19 = vsel %vm445_vm8, %v1253_v25, %v3155_v44  ;;  %v1337_v33 = vsel %vm445_vm8, %v1239_v42, %v3181_v51 }
 0x4dd   :  { %v1305_v31 = vpop.permute.xlu1 %1304  ;;  %v1287_v15 = vpop.permute.xlu0 %1286 }
 0x4de   :  { %v1364_v14 = vsel %vm445_vm8, %v3075_v16, %v1305_v31  ;;  %v1211_v16 = vpop.permute.xlu2 %1210  ;;  %v1357_v53 = vsel %vm445_vm8, %v3163_v26, %v1287_v15 }
 0x4df   :  { %1447 = vmatpush.bf16.msra.mxu2 %v1364_v14  ;;  %v1324_v46 = vsel %vm445_vm8, %v1209_v38, %v1211_v16 }
 0x4e2   :  { %1961 = vmatmul.msk.bf16.vlgmr.msra.gmra.mxu2 %vm554_vm9, %v3169_v52 }
 0x4e3   :  { %1479 = vmatpush.bf16.msrb.mxu2 %v1360_v37 }
 0x4e5   :  { %v3171_v60 = vpop.permute.xlu1 %1268  ;;  %v1243_v32 = vpop.permute.xlu0 %1242 }
 0x4e6   :  { %v1301_v7 = vpop.permute.xlu2 %1300  ;;  %v1349_v40 = vsel %vm445_vm8, %v1267_v58, %v3171_v60  ;;  %v1338_v25 = vsel %vm445_vm8, %v3181_v51, %v1243_v32 }
 0x4e7   :  { %1480 = vmatpush.bf16.msrb.mxu2 %v1354_v39  ;;  %v1363_v21 = vsel %vm445_vm8, %v3153_v34, %v1301_v7 }
 0x4eb   :  { %1481 = vmatpush.bf16.msrb.mxu2 %v1348_v50 }
 0x4ed   :  { %v1225_v48 = vpop.permute.xlu1 %1224 }
 0x4ee   :  { %v1330_v62 = vsel %vm445_vm8, %v1223_v29, %v1225_v48  ;;  %v1257_v57 = vpop.permute.xlu2 %1256  ;;  %v1356_v29 = vsel %vm445_vm8, %v3129_v11, %v3163_v26 }
 0x4ef   :  { %1482 = vmatpush.bf16.msrb.mxu2 %v1342_v3  ;;  %v1344_v6 = vsel %vm445_vm8, %v3155_v44, %v1257_v57  ;;  %v1345_v11 = vsel %vm445_vm8, %v1257_v57, %v3112_v56 }
 0x4f3   :  { %1483 = vmatpush.bf16.msrb.mxu2 %v1336_v41 }
 0x4f5   :  { %v1307_v28 = vpop.permute.xlu1 %1306 }
 0x4f6   :  { %v1365_v35 = vsel %vm445_vm8, %v1305_v31, %v1307_v28  ;;  %v1213_v2 = vpop.permute.xlu2 %1212 }
 0x4f7   :  { %1484 = vmatpush.bf16.msrb.mxu2 %v1330_v62  ;;  %1473 = vmatpush.bf16.msrb.mxu0 %v1365_v35  ;;  %v1325_v17 = vsel %vm445_vm8, %v1211_v16, %v1213_v2 }
 0x4fa   :  { %1962 = vmatmul.msk.bf16.vlgmr.msrb.gmra.mxu0 %vm554_vm9, %v3169_v52 }
 0x4fb   :  { %1485 = vmatpush.bf16.msrb.mxu2 %v1324_v46  ;;  %1505 = vmatpush.bf16.msra.mxu0 %v1361_v9 }
 0x4fd   :  { %v1271_v36 = vpop.permute.xlu1 %1270 }
 0x4fe   :  { %v1350_v30 = vsel %vm445_vm8, %v3171_v60, %v1271_v36 }
 0x4ff   :  { %1486 = vmatpush.bf16.msrb.mxu2 %v2993_v59  ;;  %1506 = vmatpush.bf16.msra.mxu0 %v3134_v45  ;;  %v1229_v59 = vpop.permute.xlu0 %1228  ;;  %v1311_v45 = vpop.permute.xlu2 %1310 }
 0x502   :  { %1487 = vmatmul.bf16.vlgmr.msrb.gmra.mxu2 %v3167_v55 }
 0x503   :  { %1507 = vmatpush.bf16.msra.mxu0 %v1349_v40 }
 0x505   :  { %v1227_v4 = vpop.permute.xlu1 %1226 }
 0x506   :  { %v1331_v49 = vsel %vm445_vm8, %v1225_v48, %v1227_v4  ;;  %v1332_v42 = vsel %vm445_vm8, %v1227_v4, %v1229_v59 }
 0x507   :  { %1508 = vmatpush.bf16.msra.mxu0 %v1343_v19  ;;  %v1215_v8 = vpop.permute.xlu0 %1214  ;;  %v1201_v24 = vpop.permute.xlu2 %1200 }
 0x508   :  { %v1326_v37 = vsel %vm445_vm8, %v1213_v2, %v1215_v8  ;;  %v1320_v0 = vsel %vm445_vm8, %v3018_v22, %v1201_v24 }
 0x50b   :  { %1509 = vmatpush.bf16.msra.mxu0 %v1337_v33 }
 0x50d   :  { %v1309_v12 = vpop.permute.xlu1 %1308 }
 0x50e   :  { %v1366_v47 = vsel %vm445_vm8, %v1307_v28, %v1309_v12  ;;  %v1367_v9 = vsel %vm445_vm8, %v1309_v12, %v1311_v45 }
 0x50f   :  { %1510 = vmatpush.bf16.msra.mxu0 %v1331_v49  ;;  %1499 = vmatpush.bf16.msra.mxu3 %v1366_v47  ;;  %v1231_v34 = vpop.permute.xlu0 %1230  ;;  %v1217_v14 = vpop.permute.xlu2 %1216 }
 0x510   :  { %1525 = vmatpush.bf16.msrb.mxu1 %v1367_v9  ;;  %v1333_v44 = vsel %vm445_vm8, %v1229_v59, %v1231_v34  ;;  %v1327_v20 = vsel %vm445_vm8, %v1215_v8, %v1217_v14 }
 0x512   :  { %1963 = vmatmul.msk.bf16.vlgmr.msra.gmra.mxu3 %vm554_vm9, %v3169_v52 }
 0x513   :  { %1511 = vmatpush.bf16.msra.mxu0 %v1325_v17  ;;  %1531 = vmatpush.bf16.msrb.mxu3 %v1362_v54 }
 0x514   :  { %1557 = vmatpush.bf16.msra.mxu1 %v1363_v21 }
 0x515   :  { %1964 = vmatmul.msk.bf16.vlgmr.msrb.gmra.mxu1 %vm554_vm9, %v3169_v52  ;;  %v1273_v38 = vpop.permute.xlu1 %1272 }
 0x516   :  { %v1351_v18 = vsel %vm445_vm8, %v1271_v36, %v1273_v38 }
 0x517   :  { %1512 = vmatpush.bf16.msra.mxu0 %v1319_v23  ;;  %1532 = vmatpush.bf16.msrb.mxu3 %v1356_v29  ;;  %v1203_v1 = vpop.permute.xlu0 %1202 }
 0x518   :  { %1558 = vmatpush.bf16.msra.mxu1 %v1357_v53  ;;  %v1321_v26 = vsel %vm445_vm8, %v1201_v24, %v1203_v1 }
 0x51a   :  { %1513 = vmatmul.bf16.vlgmr.msra.gmra.mxu0 %v3167_v55 }
 0x51b   :  { %1533 = vmatpush.bf16.msrb.mxu3 %v1350_v30 }
 0x51c   :  { %1559 = vmatpush.bf16.msra.mxu1 %v1351_v18 }
 0x51d   :  { %v1245_v63 = vpop.permute.xlu1 %1244 }
 0x51e   :  { %v1339_v58 = vsel %vm445_vm8, %v1243_v32, %v1245_v63 }
 0x51f   :  { %1534 = vmatpush.bf16.msrb.mxu3 %v1344_v6 }
 0x520   :  { %1560 = vmatpush.bf16.msra.mxu1 %v1345_v11 }
 0x523   :  { %1535 = vmatpush.bf16.msrb.mxu3 %v1338_v25 }
 0x524   :  { %1561 = vmatpush.bf16.msra.mxu1 %v1339_v58 }
 0x525   :  { %v1313_v31 = vpop.permute.xlu1 %1312 }
 0x526   :  { %v1368_v56 = vsel %vm445_vm8, %v1311_v45, %v1313_v31 }
 0x527   :  { %1536 = vmatpush.bf16.msrb.mxu3 %v1332_v42  ;;  %1551 = vmatpush.bf16.msra.mxu2 %v1368_v56 }
 0x528   :  { %1562 = vmatpush.bf16.msra.mxu1 %v1333_v44 }
 0x52a   :  { %1965 = vmatmul.msk.bf16.vlgmr.msra.gmra.mxu2 %vm554_vm9, %v3169_v52 }
 0x52b   :  { %1537 = vmatpush.bf16.msrb.mxu3 %v1326_v37 }
 0x52c   :  { %1563 = vmatpush.bf16.msra.mxu1 %v1327_v20 }
 0x52d   :  { %v1315_v39 = vpop.permute.xlu1 %1314 }
 0x52e   :  { %v1369_v16 = vsel %vm445_vm8, %v1313_v31, %v1315_v39 }
 0x52f   :  { %1538 = vmatpush.bf16.msrb.mxu3 %v1320_v0  ;;  %1577 = vmatpush.bf16.msrb.mxu0 %v1369_v16 }
 0x530   :  { %1564 = vmatpush.bf16.msra.mxu1 %v1321_v26 }
 0x532   :  { %1539 = vmatmul.bf16.vlgmr.msrb.gmra.mxu3 %v3167_v55  ;;  %1966 = vmatmul.msk.bf16.vlgmr.msrb.gmra.mxu0 %vm554_vm9, %v3169_v52 }
 0x533   :  { %1565 = vmatmul.bf16.vlgmr.msra.gmra.mxu1 %v3167_v55 }
 0x547   :  { %v1462_v60 = vpop.f32.mrf.mxu1 }
 0x54f   :  { %v1464_v22 = vpop.f32.mrf.mxu1 }
 0x551   :  { %v1436_v50 = vpop.f32.mrf.mxu3 }
 0x559   :  { %v1438_v48 = vpop.f32.mrf.mxu3 }
 0x565   :  { %v1449_v3 = vpop.f32.mrf.mxu2 }
 0x566   :  { %v3245_v51 = vadd.f32 %v1449_v3, %v1436_v50 }
 0x568   :  { %v1583_v52 = vmul.f32 %v3245_v51, %v2675_v61 }
 0x56a   :  { %v1597_v4 = vmul.f32 %v1583_v52, %v1583_v52 }
 0x56d   :  { %v1451_v7 = vpop.f32.mrf.mxu2 }
 0x577   :  { %v1475_v41 = vpop.f32.mrf.mxu0 }
 0x578   :  { %v3247_v32 = vadd.f32 %v1475_v41, %v1462_v60 }
 0x57a   :  { %v1584_v2 = vmul.f32 %v3247_v32, %v2681_v5 }
 0x57c   :  { %v1598_v33 = vmul.f32 %v1584_v2, %v1584_v2  ;;  %v1589_v45 = vadd.f32 %v1584_v2, %v1583_v52 }
 0x57e   :  { %v1603_v9 = vadd.f32 %v1598_v33, %v1597_v4 }
 0x57f   :  { %v1477_v62 = vpop.f32.mrf.mxu0 }
 0x580   :  { %v1613_v62 = vld [vmem:[%s3315_s5] sm:$0xff] }
 0x585   :  { %v1488_v28 = vpop.f32.mrf.mxu2 }
 0x58d   :  { %v1490_v35 = vpop.f32.mrf.mxu2 }
 0x592   :  { %v1527_v15 = vpop.f32.mrf.mxu1 }
 0x595   :  { %v1501_v57 = vpop.f32.mrf.mxu3 }
 0x596   :  { %v3253_v19 = vadd.f32 %v1501_v57, %v1488_v28 }
 0x597   :  { %v1514_v46 = vpop.f32.mrf.mxu0 }
 0x598   :  { %v1585_v59 = vmul.f32 %v3253_v19, %v2689_v10  ;;  %v3257_v49 = vadd.f32 %v1527_v15, %v1514_v46  ;;  %v1626_v46 = vld [vmem:[%s3316_s6] sm:$0xff] }
 0x59a   :  { %v1529_v36 = vpop.f32.mrf.mxu1  ;;  %v1599_v54 = vmul.f32 %v1585_v59, %v1585_v59  ;;  %v1586_v17 = vmul.f32 %v3257_v49, %v2691_v13  ;;  %v1590_v29 = vadd.f32 %v1589_v45, %v1585_v59 }
 0x59b   :  { %v1670_v36 = vld [vmem:[%s3317_s8] sm:$0xff] }
 0x59c   :  { %v1604_v8 = vadd.f32 %v1603_v9, %v1599_v54  ;;  %v1600_v38 = vmul.f32 %v1586_v17, %v1586_v17  ;;  %v1591_v6 = vadd.f32 %v1590_v29, %v1586_v17 }
 0x59d   :  { %v1503_v40 = vpop.f32.mrf.mxu3 }
 0x59e   :  { %v1605_v58 = vadd.f32 %v1604_v8, %v1600_v38 }
 0x59f   :  { %v1516_v55 = vpop.f32.mrf.mxu0 }
 0x5ad   :  { %v1553_v47 = vpop.f32.mrf.mxu2 }
 0x5af   :  { %v1579_v21 = vpop.f32.mrf.mxu0 }
 0x5b0   :  { %v1566_v12 = vpop.f32.mrf.mxu1 }
 0x5b1   :  { %v1580_v23 = vadd.f32 %v1579_v21, %v1566_v12 }
 0x5b3   :  { %v1588_v18 = vmul.f32 %v1580_v23, %v2717_v43 }
 0x5b5   :  { %v1540_v53 = vpop.f32.mrf.mxu3  ;;  %v1555_v63 = vpop.f32.mrf.mxu2  ;;  %v1602_v34 = vmul.f32 %v1588_v18, %v1588_v18 }
 0x5b6   :  { %v1554_v30 = vadd.f32 %v1553_v47, %v1540_v53 }
 0x5b7   :  { %v1581_v44 = vpop.f32.mrf.mxu0 }
 0x5b8   :  { %v1587_v11 = vmul.f32 %v1554_v30, %v2705_v27  ;;  %v1568_v24 = vpop.f32.mrf.mxu1 }
 0x5ba   :  { %v1592_v25 = vadd.f32 %v1591_v6, %v1587_v11  ;;  %v1601_v42 = vmul.f32 %v1587_v11, %v1587_v11 }
 0x5bc   :  { %v1593_v31 = vadd.f32 %v1592_v25, %v1588_v18  ;;  %v1606_v56 = vadd.f32 %v1605_v58, %v1601_v42 }
 0x5bd   :  { %v1542_v14 = vpop.f32.mrf.mxu3 }
 0x5be   :  { %1594 = vadd.xlane.f32.xlu2 %v1593_v31  ;;  %v1607_v37 = vadd.f32 %v1606_v56, %v1602_v34 }
 0x5c0   :  { %1608 = vadd.xlane.f32.xlu0 %v1607_v37 }
 0x631   :  { %v1595_v20 = vpop.xlane.xlu2 %1594 }
 0x632   :  { %v1596_v1 = vmul.f32 0.001953125, %v1595_v20 }
 0x633   :  { %v1609_v0 = vpop.xlane.xlu0 %1608 }
 0x634   :  { %v1611_v26 = vmul.f32 %v1596_v1, %v1596_v1  ;;  %v1610_v39 = vmul.f32 0.001953125, %v1609_v0 }
 0x636   :  { %v1612_v16 = vsub.f32 %v1610_v39, %v1611_v26 }
 0x638   :  { %v1614_v60 = vadd.f32 1e-05, %v1612_v16 }
 0x63a   :  { %2032 = vrsqrt.f32 %v1614_v60  ;;  %vm1621_vm1 = vweird.f32 %v1614_v60 }
 0x640   :  { %v2033_v50 = vpop.eup %2032 }
 0x641   :  { %v1616_v3 = vmul.f32 %v2033_v50, %v1614_v60  ;;  %vm1622_vm0 = vweird.f32 %v2033_v50 }
 0x642   :  { %vm1623_vm2 = vmor %vm1621_vm1, %vm1622_vm0 }
 0x643   :  { %v1617_v22 = vmul.f32 %v2033_v50, %v1616_v3 }
 0x645   :  { %v1618_v48 = vmul.f32 0.5, %v1617_v22 }
 0x647   :  { %v1619_v7 = vsub.f32 1.5, %v1618_v48 }
 0x649   :  { %v1620_v41 = vmul.f32 %v2033_v50, %v1619_v7 }
 0x64b   :  { %v1624_v28 = vsel %vm1623_vm2, %v2033_v50, %v1620_v41 }
 0x64c   :  { %v1625_v35 = vmul.f32 %v1624_v28, %v1613_v62 }
 0x64e   :  { %1631 = vperm.xlu1 %2025, %v1625_v35   ;;  %v1627_v15 = vmul.f32 %v1625_v35, %v1596_v1 }
 0x650   :  { %v1628_v57 = vsub.f32 %v1626_v46, %v1627_v15 }
 0x656   :  { %1642 = vperm.xlu1 %2025, %v1628_v57  }
 0x65e   :  { %1673 = vperm.xlu1 %2025, %v1670_v36  }
 0x6c0   :  { %v1632_v55 = vpop.permute.xlu1 %1631 }
 0x6c1   :  { %v1634_v40 = vmul.f32 %v1632_v55, %v3245_v51  ;;  %v1635_v52 = vmul.f32 %v1632_v55, %v3247_v32  ;;  %v1636_v2 = vmul.f32 %v1632_v55, %v3253_v19  ;;  %v1638_v4 = vmul.f32 %v1632_v55, %v1554_v30 }
 0x6c2   :  { %v1637_v59 = vmul.f32 %v1632_v55, %v3257_v49  ;;  %v1639_v45 = vmul.f32 %v1632_v55, %v1580_v23 }
 0x6c8   :  { %v1643_v33 = vpop.permute.xlu1 %1642 }
 0x6c9   :  { %v1645_v12 = vadd.f32 %v1643_v33, %v1634_v40  ;;  %v1646_v47 = vadd.f32 %v1643_v33, %v1635_v52  ;;  %v1647_v9 = vadd.f32 %v1643_v33, %v1636_v2  ;;  %v1649_v54 = vadd.f32 %v1643_v33, %v1638_v4 }
 0x6ca   :  { %v1648_v17 = vadd.f32 %v1643_v33, %v1637_v59  ;;  %v1650_v21 = vadd.f32 %v1643_v33, %v1639_v45 }
 0x6cb   :  { %v1651_v29 = vmax.f32 %v1645_v12, 0.0  ;;  %v1652_v53 = vmax.f32 %v1646_v47, 0.0  ;;  %v1653_v8 = vmax.f32 %v1647_v9, 0.0  ;;  %v1655_v38 = vmax.f32 %v1649_v54, 0.0 }
 0x6cc   :  { %v1654_v51 = vmax.f32 %v1648_v17, 0.0  ;;  %v1656_v18 = vmax.f32 %v1650_v21, 0.0 }
 0x6cd   :  { %v1657_v32 = vmul.f32 %v1651_v29, %v2675_v61  ;;  %v1658_v19 = vmul.f32 %v1652_v53, %v2681_v5  ;;  %v1659_v30 = vmul.f32 %v1653_v8, %v2689_v10  ;;  %v1661_v49 = vmul.f32 %v1655_v38, %v2705_v27 }
 0x6ce   :  { %v1660_v23 = vmul.f32 %v1654_v51, %v2691_v13  ;;  %v1662_v6 = vmul.f32 %v1656_v18, %v2717_v43  ;;  %v1663_v43 = vld [vmem:[%s3318_s7] sm:$0xf] }
 0x6cf   :  { %v1664_v11 = vpack.c.bf16 %v1657_v32, %v1657_v32  ;;  %v1665_v24 = vpack.c.bf16 %v1658_v19, %v1658_v19  ;;  %v1666_v63 = vpack.c.bf16 %v1659_v30, %v1659_v30  ;;  %v1668_v58 = vpack.c.bf16 %v1661_v49, %v1661_v49 }
 0x6d0   :  { %v1667_v34 = vpack.c.bf16 %v1660_v23, %v1660_v23  ;;  %v1669_v25 = vpack.c.bf16 %v1662_v6, %v1662_v6  ;;  %v1674_v44 = vpop.permute.xlu1 %1673 }
 0x6d1   :  { %v1682_v42 = vsel %vm1680_vm3, %v1664_v11, 0  ;;  %v1685_v61 = vsel %vm1680_vm3, %v1665_v24, 0  ;;  %v1688_v5 = vsel %vm1680_vm3, %v1666_v63, 0  ;;  %v1694_v10 = vsel %vm1680_vm3, %v1668_v58, 0 }
 0x6d2   :  { %1706 = vmatpush.bf16.msrb.mxu2 %v1682_v42  ;;  %1719 = vmatpush.bf16.msra.mxu3 %v1685_v61  ;;  %v1691_v13 = vsel %vm1680_vm3, %v1667_v34, 0  ;;  %v1697_v27 = vsel %vm1680_vm3, %v1669_v25, 0 }
 0x6d3   :  { %1732 = vmatpush.bf16.msra.mxu0 %v1688_v5  ;;  %1758 = vmatpush.bf16.msrb.mxu1 %v1694_v10 }
 0x6d5   :  { %1967 = vmatmul.msk.bf16.vlgmr.msrb.gmra.mxu2 %vm1676_vm4, %v1663_v43  ;;  %1968 = vmatmul.msk.bf16.vlgmr.msra.gmra.mxu3 %vm1676_vm4, %v1663_v43 }
 0x6d6   :  { %1745 = vmatpush.bf16.msra.mxu2 %v1691_v13  ;;  %1771 = vmatpush.bf16.msrb.mxu3 %v1697_v27 }
 0x6d7   :  { %1969 = vmatmul.msk.bf16.vlgmr.msra.gmra.mxu0 %vm1676_vm4, %v1663_v43  ;;  %1971 = vmatmul.msk.bf16.vlgmr.msrb.gmra.mxu1 %vm1676_vm4, %v1663_v43 }
 0x6e5   :  { %1970 = vmatmul.msk.bf16.vlgmr.msra.gmra.mxu2 %vm1676_vm4, %v1663_v43  ;;  %1972 = vmatmul.msk.bf16.vlgmr.msrb.gmra.mxu3 %vm1676_vm4, %v1663_v43 }
 0x754   :  { %v1734_v31 = vpop.f32.mrf.mxu0  ;;  %v1760_v56 = vpop.f32.mrf.mxu1 }
 0x755   :  { %v1735_v14 = vadd.f32 %v1734_v31, %v1674_v44  ;;  %v1761_v37 = vadd.f32 %v1760_v56, %v1674_v44 }
 0x757   :  { %1779 = vst [vmem:[%s3319_s10 + $0x10] sm:$0xff] %v1735_v14 }
 0x758   :  { %1781 = vst [vmem:[%s3319_s10 + $0x20] sm:$0xff] %v1761_v37  ;;  %v1708_v20 = vpop.f32.mrf.mxu2  ;;  %v1721_v1 = vpop.f32.mrf.mxu3 }
 0x759   :  { %v1709_v0 = vadd.f32 %v1708_v20, %v1674_v44  ;;  %v1722_v26 = vadd.f32 %v1721_v1, %v1674_v44 }
 0x75b   :  { %1777 = vst [vmem:[%s3319_s10] sm:$0xff] %v1709_v0 }
 0x75c   :  { %v1736_v39 = vpop.f32.mrf.mxu0  ;;  %v1762_v16 = vpop.f32.mrf.mxu1  ;;  %1778 = vst [vmem:[%s3319_s10 + $0x8] sm:$0xff] %v1722_v26 }
 0x760   :  { %v1710_v60 = vpop.f32.mrf.mxu2  ;;  %v1723_v50 = vpop.f32.mrf.mxu3 }
 0x768   :  { %v1747_v3 = vpop.f32.mrf.mxu2  ;;  %v1773_v22 = vpop.f32.mrf.mxu3 }
 0x769   :  { %v1748_v48 = vadd.f32 %v1747_v3, %v1674_v44  ;;  %v1774_v7 = vadd.f32 %v1773_v22, %v1674_v44 }
 0x76b   :  { %1780 = vst [vmem:[%s3319_s10 + $0x18] sm:$0xff] %v1748_v48 }
 0x76c   :  { %1782 = vst [vmem:[%s3319_s10 + $0x28] sm:$0xff] %v1774_v7 }
 0x770   :  { %v1749_v41 = vpop.f32.mrf.mxu2  ;;  %v1775_v62 = vpop.f32.mrf.mxu3 }

</bundles_post_ra>
